<compile_context>
chip_gen: v5e
topology: v5e:2x2
jax: 0.10.0
libtpu: 0.0.40
codegen_flags: <defaults>
</compile_context>

<pallas_src>
import math

import jax
import jax.numpy as jnp
from jax import lax
from jax.experimental import pallas as pl
from jax.experimental.pallas import tpu as pltpu

# ----------------------------------------------------------------------------
# constants
# ----------------------------------------------------------------------------
NUM_LAB_POINTS = 48
NUM_RGB_POINTS = 48
NUM_HSV_POINTS = 64
TOTAL_POINTS = NUM_LAB_POINTS + NUM_RGB_POINTS + NUM_HSV_POINTS  # 160
KNOTS = 16                       # knots per individual curve
NUM_CURVES = TOTAL_POINTS // KNOTS
BACKBONE_FEATS = 1792            # efficientnetv2_rw_s classifier in_features

LANE = 128                       # TPU lane width
SUBLANE = 8                      # TPU sublane count (f32)
MAX_S_TILE = 512                 # rows of 128 lanes per grid step (DMA block)
CHUNK_ROWS = 32                  # rows per inner strip-mined step (vregs)

_EPS = 6.0 / 29.0


def _nan0(x):
    # emulate torch `img[img != img] = 0`
    return jnp.where(x == x, x, jnp.zeros_like(x))


# ----------------------------------------------------------------------------
# in-kernel colour-space helpers (operate on (rows, 128) float32 arrays)
# ----------------------------------------------------------------------------
def _srgb_to_linear(c):
    big = jnp.exp(2.4 * jnp.log((jnp.maximum(c, 1e-4) + 0.055) * (1.0 / 1.055)))
    return jnp.where(c <= 0.04045, c * (1.0 / 12.92), big)


def _linear_to_srgb(c):
    big = 1.055 * jnp.exp((1.0 / 2.4) * jnp.log(jnp.maximum(c, 1e-4))) - 0.055
    return jnp.where(c <= 0.0031308, 12.92 * c, big)


def _rgb_to_lab(r, g, b):
    r = _srgb_to_linear(r)
    g = _srgb_to_linear(g)
    b = _srgb_to_linear(b)
    x = 0.412453 * r + 0.357580 * g + 0.180423 * b
    y = 0.212671 * r + 0.715160 * g + 0.072169 * b
    z = 0.019334 * r + 0.119193 * g + 0.950227 * b
    x = x * (1.0 / 0.950456)
    z = z * (1.0 / 1.088754)

    def f(t):
        small = t * (1.0 / (3.0 * _EPS * _EPS)) + 4.0 / 29.0
        big = jnp.exp(jnp.log(jnp.maximum(t, 1e-4)) * (1.0 / 3.0))  # cube root
        return jnp.where(t <= _EPS ** 3, small, big)

    fx, fy, fz = f(x), f(y), f(z)
    L = 116.0 * fy - 16.0
    A = 500.0 * (fx - fy)
    Bc = 200.0 * (fy - fz)
    # normalise: L in [0,1], a/b in [0,1]
    L = L * (1.0 / 100.0)
    A = A * (0.5 / 110.0) + 0.5
    Bc = Bc * (0.5 / 110.0) + 0.5
    return _nan0(L), _nan0(A), _nan0(Bc)


def _lab_to_rgb(L, A, Bc):
    L = L * 100.0
    A = (A * 2.0 - 1.0) * 110.0
    Bc = (Bc * 2.0 - 1.0) * 110.0
    fy = (L + 16.0) * (1.0 / 116.0)
    fx = fy + A * (1.0 / 500.0)
    fz = fy - Bc * (1.0 / 200.0)

    def finv(f):
        small = 3.0 * _EPS * _EPS * (f - 4.0 / 29.0)
        m = jnp.maximum(f, 1e-4)
        big = m * m * m
        return jnp.where(f <= _EPS, small, big)

    x = finv(fx) * 0.950456
    y = finv(fy)
    z = finv(fz) * 1.088754
    r = 3.2404542 * x - 1.5371385 * y - 0.4985314 * z
    g = -0.9692660 * x + 1.8760108 * y + 0.0415560 * z
    b = 0.0556434 * x - 0.2040259 * y + 1.0572252 * z
    return (_nan0(_linear_to_srgb(r)),
            _nan0(_linear_to_srgb(g)),
            _nan0(_linear_to_srgb(b)))


def _rgb_to_hsv(r, g, b):
    # Inputs clipped -> finite; nested where resolves max ties (gray -> h=0).
    r = jnp.clip(r, 1e-9, 1.0)
    g = jnp.clip(g, 1e-9, 1.0)
    b = jnp.clip(b, 1e-9, 1.0)
    mx = jnp.maximum(jnp.maximum(r, g), b)
    mn = jnp.minimum(jnp.minimum(r, g), b)
    df = mx - mn
    inv_df = pl.reciprocal(df + 1e-10, approx=True)        # EUP, off the VALU slot
    h = jnp.where(r == mx, (g - b) * inv_df,
                  jnp.where(g == mx, 2.0 + (b - r) * inv_df,
                            4.0 + (r - g) * inv_df))
    h = h * (1.0 / 6.0)
    h = jnp.where(h < 0.0, h + 1.0, h)
    s = df * pl.reciprocal(mx, approx=True)
    v = mx
    return h, s, v


def _hsv_to_rgb(h, s, v):
    h = jnp.clip(h, 0.0, 1.0)
    s = jnp.clip(s, 0.0, 1.0)
    v = jnp.clip(v, 0.0, 1.0)
    h360 = h * 360.0
    c = v * s
    low = v - c
    slope = c * (1.0 / 60.0)
    r = (v - slope * jnp.clip(h360 - 60.0, 0.0, 60.0)
         + slope * jnp.clip(h360 - 240.0, 0.0, 60.0))
    g = (low + slope * jnp.clip(h360, 0.0, 60.0)
         - slope * jnp.clip(h360 - 180.0, 0.0, 60.0))
    b = (low + slope * jnp.clip(h360 - 120.0, 0.0, 60.0)
         - slope * jnp.clip(h360 - 300.0, 0.0, 60.0))
    return (jnp.clip(r, 0.0, 1.0), jnp.clip(g, 0.0, 1.0), jnp.clip(b, 0.0, 1.0))


# ----------------------------------------------------------------------------
# Pallas kernels
# ----------------------------------------------------------------------------
def backbone_kernel(pooled_ref, w1_ref, b1_ref, w2_ref, b2_ref, out_ref):
    """Surrogate backbone head on pre-pooled features:
    (B,3) -> 3->1792 (ReLU) -> 1792->160.  The GAP itself runs in XLA."""
    pooled = pooled_ref[...]                 # (B, 3)
    h = (pooled[:, 0:1] * w1_ref[0:1, :]
         + pooled[:, 1:2] * w1_ref[1:2, :]
         + pooled[:, 2:3] * w1_ref[2:3, :]) + b1_ref[...]
    h = jnp.maximum(h, 0.0)
    out_ref[...] = (jnp.dot(h, w2_ref[...], preferred_element_type=jnp.float32)
                    + b2_ref[...])


def _make_curl_kernel(s_tile, chunk, cdtype):
    """Build the CURL kernel for one (pixel-tile, batch) grid step.

    The BlockSpec block is (1, 3, s_tile, 128); the kernel strip-mines it
    into `chunk`-row pieces so every live value is a handful of vregs
    (no spills).  Curve basis/accumulation runs in `cdtype` (bf16 on v6e/v7x,
    f32 otherwise)."""
    n_chunks = s_tile // chunk

    def basis_of(x01):
        # 15 piecewise-linear basis terms clip(x*15 - i, 0, 1), i = 0..14
        x = (x01 * float(KNOTS - 1)).astype(cdtype)
        return [jnp.clip(x - float(i), 0.0, 1.0) for i in range(KNOTS - 1)]

    def curve_scale(basis, knots_ref, deltas_ref, b, base):
        # k0 folded into the first accumulate (no broadcast-add init);
        # two partial sums break the 15-deep serial add chain.
        acc0 = (knots_ref[b, base].astype(cdtype)
                + deltas_ref[b, base].astype(cdtype) * basis[0])
        acc1 = deltas_ref[b, base + 1].astype(cdtype) * basis[1]
        for i in range(2, KNOTS - 1):
            term = deltas_ref[b, base + i].astype(cdtype) * basis[i]
            if i & 1:
                acc1 = acc1 + term
            else:
                acc0 = acc0 + term
        return (acc0 + acc1).astype(jnp.float32)

    def apply_curve(chans, basis, knots_ref, deltas_ref, b, base, cout,
                    clip_all=False):
        scale = curve_scale(basis, knots_ref, deltas_ref, b, base)
        chans = list(chans)
        chans[cout] = chans[cout] * scale
        if clip_all:
            return [jnp.clip(c, 0.0, 1.0) for c in chans]
        chans[cout] = jnp.clip(chans[cout], 0.0, 1.0)
        return chans

    def curl_kernel(knots_ref, deltas_ref, img_ref, mask_ref, out_ref):
        b = pl.program_id(1)        # grid = (pixel_tiles, batch)

        def chunk_body(ci, carry):
            row = pl.multiple_of(ci * chunk, chunk)
            sl = pl.ds(row, chunk)
            r = img_ref[0, 0, sl, :]
            g = img_ref[0, 1, sl, :]
            bl = img_ref[0, 2, sl, :]
            m = mask_ref[0, 0, sl, :]

            # ---------------- LAB branch ----------------
            lab = list(_rgb_to_lab(r, g, bl))
            lab = apply_curve(lab, basis_of(lab[0]), knots_ref, deltas_ref,
                              b, 0, 0, clip_all=True)
            lab = apply_curve(lab, basis_of(lab[1]), knots_ref, deltas_ref,
                              b, 16, 1)
            lab = apply_curve(lab, basis_of(lab[2]), knots_ref, deltas_ref,
                              b, 32, 2)
            lab = [c * m for c in lab]

            # ---------------- RGB branch ----------------
            rgb = list(_lab_to_rgb(*lab))
            rgb = apply_curve(rgb, basis_of(rgb[0]), knots_ref, deltas_ref,
                              b, 48, 0, clip_all=True)
            rgb = apply_curve(rgb, basis_of(rgb[1]), knots_ref, deltas_ref,
                              b, 64, 1)
            rgb = apply_curve(rgb, basis_of(rgb[2]), knots_ref, deltas_ref,
                              b, 80, 2)
            rgb = [c * m for c in rgb]

            # ---------------- HSV branch ----------------
            hsv = list(_rgb_to_hsv(*rgb))
            hue_basis = basis_of(hsv[0])     # shared by the two hue-driven curves
            hsv = apply_curve(hsv, hue_basis, knots_ref, deltas_ref,
                              b, 96, 1, clip_all=True)
            hsv = apply_curve(hsv, hue_basis, knots_ref, deltas_ref,
                              b, 112, 2)
            hsv = apply_curve(hsv, basis_of(hsv[1]), knots_ref, deltas_ref,
                              b, 128, 1)
            hsv = apply_curve(hsv, basis_of(hsv[2]), knots_ref, deltas_ref,
                              b, 144, 2)
            hsv = [c * m for c in hsv]

            res_r, res_g, res_b = _hsv_to_rgb(*hsv)

            # dense (chunk, 128) unmasked stores
            out_ref[0, 0, sl, :] = jnp.clip(r + res_r, 0.0, 1.0) * m
            out_ref[0, 1, sl, :] = jnp.clip(g + res_g, 0.0, 1.0) * m
            out_ref[0, 2, sl, :] = jnp.clip(bl + res_b, 0.0, 1.0) * m
            return carry

        lax.fori_loop(0, n_chunks, chunk_body, 0)

    return curl_kernel


# ----------------------------------------------------------------------------
# plain-JAX glue
# ----------------------------------------------------------------------------
def _gradient_regulariser(knots):
    """Sum of squared slope differences of all 10 curves (per batch sample).
    Mirrors CURL's apply_curve slope_sqr_diff accumulation (first 14 slopes)."""
    total = jnp.zeros((knots.shape[0],), jnp.float32)
    for base in range(0, TOTAL_POINTS, KNOTS):
        k = knots[:, base:base + KNOTS]
        slope = k[:, 1:15] - k[:, 0:14]
        d = slope[:, 1:] - slope[:, :-1]
        total = total + jnp.sum(d * d, axis=-1)
    return total


def init_params(seed=42):
    key = jax.random.PRNGKey(seed)
    kw1, kw2 = jax.random.split(key)
    w1 = jax.random.normal(kw1, (3, BACKBONE_FEATS), jnp.float32) * 0.05
    b1 = jnp.zeros((1, BACKBONE_FEATS), jnp.float32)
    w2 = (jax.random.normal(kw2, (BACKBONE_FEATS, TOTAL_POINTS), jnp.float32)
          * (0.1 / math.sqrt(BACKBONE_FEATS)))
    b2 = jnp.zeros((1, TOTAL_POINTS), jnp.float32)
    return {"w1": w1, "b1": b1, "w2": w2, "b2": b2}


def _round_up(x, m):
    return ((x + m - 1) // m) * m


def _curve_compute_dtype():
    """bf16 curve evaluation only on generations with a bf16 VALU (v6e/v7x);
    f32 everywhere else (v5e and older have no bf16 VPU path)."""
    try:
        kind = jax.devices()[0].device_kind.lower()
    except Exception:
        return jnp.float32
    if ("v6" in kind) or ("v7" in kind) or ("trillium" in kind):
        return jnp.bfloat16
    return jnp.float32


def gcurlnet_forward(params, img, mask, L=None, R=None, H=None):
    """JAX/Pallas equivalent of GCURLNet.forward(img, mask, L, R, H).
    Like the PyTorch reference, the L/R/H arguments are ignored because they
    are immediately overwritten by the backbone's curve predictions."""
    del L, R, H
    B, C, Hs, Ws = img.shape
    assert C == 3, "GCURLNet expects a 3-channel RGB image"
    HW = Hs * Ws
    img_f = img.astype(jnp.float32)
    mask_f = mask.astype(jnp.float32)

    # --- backbone surrogate (curve-parameter prediction) ------------------
    # TODO(synk): pretrained timm efficientnetv2_rw_s is not reproducible here;
    # replaced by a deterministic GAP + MLP head with the same output layout.
    pooled = jnp.mean(img_f, axis=(2, 3))                     # (B, 3)
    curves = pl.pallas_call(
        backbone_kernel,
        out_shape=jax.ShapeDtypeStruct((B, TOTAL_POINTS), jnp.float32),
    )(pooled, params["w1"], params["b1"], params["w2"], params["b2"])

    # knots are exponentiated once here (tiny, parameter-only) and shared by
    # the kernel and the gradient regulariser; per-segment knot deltas are
    # also precomputed so the kernel does no scalar subtracts per step.
    knots = jnp.exp(curves)                                   # (B, 160)
    greg = _gradient_regulariser(knots)                       # (B,)
    kk = knots.reshape(B, NUM_CURVES, KNOTS)
    deltas = jnp.concatenate(
        [kk[:, :, 1:] - kk[:, :, :-1],
         jnp.zeros((B, NUM_CURVES, 1), jnp.float32)],
        axis=-1).reshape(B, TOTAL_POINTS)                     # (B, 160)

    # --- tile policy: balanced split, bounded padding ----------------------
    S = _round_up(pl.cdiv(HW, LANE), SUBLANE)       # rows of 128 lanes
    n_tiles = pl.cdiv(S, MAX_S_TILE)
    if B == 1 and n_tiles == 1 and S >= 2 * CHUNK_ROWS:
        n_tiles = 2        # let v7x split the pixel axis across both cores
    S_TILE = _round_up(pl.cdiv(S, n_tiles), SUBLANE)
    if S_TILE > CHUNK_ROWS:
        S_TILE = _round_up(S_TILE, CHUNK_ROWS)
        chunk = CHUNK_ROWS
    else:
        chunk = S_TILE
    S_pad = S_TILE * n_tiles
    HW_pad = S_pad * LANE

    # --- layout for the CURL kernel: (B, 3, S_pad, 128) --------------------
    img_flat = img_f.reshape(B, 3, HW)
    mask_flat = mask_f.reshape(B, 1, HW)
    if HW_pad != HW:
        # TODO(synk): ragged tail is zero-padded in XLA (one extra HBM pass);
        # an in-kernel tail mask would avoid it. Aligned sizes take the
        # zero-copy fast path below.
        pad = ((0, 0), (0, 0), (0, HW_pad - HW))
        img_flat = jnp.pad(img_flat, pad)
        mask_flat = jnp.pad(mask_flat, pad)
    img_t = img_flat.reshape(B, 3, S_pad, LANE)
    mask_t = mask_flat.reshape(B, 1, S_pad, LANE)

    # VMEM budget: double-buffered img+mask+out blocks (~3.6 MB at S_TILE=512)
    # plus elementwise intermediates; 32 MiB stays under v7x's 64 MiB physical
    # VMEM while lifting v5e's 16 MiB default scoped limit.
    vmem_limit = 32 * 1024 * 1024

    curl_kernel = _make_curl_kernel(S_TILE, chunk, _curve_compute_dtype())

    # --- CURL layer (per-pixel hot path, in Pallas) ------------------------
    out = pl.pallas_call(
        curl_kernel,
        out_shape=jax.ShapeDtypeStruct((B, 3, S_pad, LANE), jnp.float32),
        grid_spec=pltpu.PrefetchScalarGridSpec(
            num_scalar_prefetch=2,
            grid=(n_tiles, B),          # pixel-tile axis first (megacore split)
            in_specs=[
                pl.BlockSpec((1, 3, S_TILE, LANE), lambda t, b, kn, dl: (b, 0, t, 0)),
                pl.BlockSpec((1, 1, S_TILE, LANE), lambda t, b, kn, dl: (b, 0, t, 0)),
            ],
            out_specs=pl.BlockSpec((1, 3, S_TILE, LANE),
                                   lambda t, b, kn, dl: (b, 0, t, 0)),
        ),
        compiler_params=pltpu.CompilerParams(
            dimension_semantics=("parallel", "parallel"),
            vmem_limit_bytes=vmem_limit),
    )(knots, deltas, img_t, mask_t)

    if HW_pad != HW:
        out = out.reshape(B, 3, HW_pad)[:, :, :HW]
    out = out.reshape(B, 3, Hs, Ws)
    return out, greg


# ----------------------------------------------------------------------------
# demo
# ----------------------------------------------------------------------------
if __name__ == "__main__":
    B, C, Hs, Ws = 2, 3, 16, 16
    key = jax.random.PRNGKey(0)
    k_img, k_mask, k_l, k_r, k_h = jax.random.split(key, 5)

    img = jax.random.uniform(k_img, (B, C, Hs, Ws), jnp.float32)
    mask = (jax.random.uniform(k_mask, (B, 1, Hs, Ws)) > 0.2).astype(jnp.float32)
    # L/R/H inputs exist in the PyTorch signature but are overwritten inside
    # forward; provided here only for signature fidelity.
    L_in = jax.random.normal(k_l, (B, NUM_LAB_POINTS), jnp.float32)
    R_in = jax.random.normal(k_r, (B, NUM_RGB_POINTS), jnp.float32)
    H_in = jax.random.normal(k_h, (B, NUM_HSV_POINTS), jnp.float32)

    params = init_params(seed=42)

    out_img, grad_reg = gcurlnet_forward(params, img, mask, L_in, R_in, H_in)
    jax.block_until_ready((out_img, grad_reg))

    assert out_img.shape == (B, 3, Hs, Ws)
    assert grad_reg.shape == (B,)
    print("KERNEL_OK")
</pallas_src>

<mosaic_0001>
module attributes {stable_mosaic.version = 11 : i64} {
  func.func @backbone_kernel(%arg0: memref<2x3xf32, #tpu.memory_space<vmem>>, %arg1: memref<3x1792xf32, #tpu.memory_space<vmem>>, %arg2: memref<1x1792xf32, #tpu.memory_space<vmem>>, %arg3: memref<1792x160xf32, #tpu.memory_space<vmem>>, %arg4: memref<1x160xf32, #tpu.memory_space<vmem>>, %arg5: memref<2x160xf32, #tpu.memory_space<vmem>>) attributes {dimension_semantics = [], scalar_prefetch = 0 : i64, scratch_operands = 0 : i64, tpu.core_type = #tpu.core_type<tc>} {
    %c0 = arith.constant 0 : index
    %c0_0 = arith.constant 0 : index
    %0 = vector.load %arg0[%c0, %c0_0] : memref<2x3xf32, #tpu.memory_space<vmem>>, vector<2x3xf32>
    %1 = vector.extract_strided_slice %0 {offsets = [0, 0], sizes = [2, 1], strides = [1, 1]} : vector<2x3xf32> to vector<2x1xf32>
    %c0_1 = arith.constant 0 : index
    %c0_2 = arith.constant 0 : index
    %2 = vector.load %arg1[%c0_1, %c0_2] : memref<3x1792xf32, #tpu.memory_space<vmem>>, vector<1x1792xf32>
    %3 = vector.broadcast %1 : vector<2x1xf32> to vector<2x1792xf32>
    %4 = vector.broadcast %2 : vector<1x1792xf32> to vector<2x1792xf32>
    %5 = arith.mulf %3, %4 : vector<2x1792xf32>
    %6 = vector.extract_strided_slice %0 {offsets = [0, 1], sizes = [2, 1], strides = [1, 1]} : vector<2x3xf32> to vector<2x1xf32>
    %c1 = arith.constant 1 : index
    %c0_3 = arith.constant 0 : index
    %7 = vector.load %arg1[%c1, %c0_3] : memref<3x1792xf32, #tpu.memory_space<vmem>>, vector<1x1792xf32>
    %8 = vector.broadcast %6 : vector<2x1xf32> to vector<2x1792xf32>
    %9 = vector.broadcast %7 : vector<1x1792xf32> to vector<2x1792xf32>
    %10 = arith.mulf %8, %9 : vector<2x1792xf32>
    %11 = arith.addf %5, %10 : vector<2x1792xf32>
    %12 = vector.extract_strided_slice %0 {offsets = [0, 2], sizes = [2, 1], strides = [1, 1]} : vector<2x3xf32> to vector<2x1xf32>
    %c2 = arith.constant 2 : index
    %c0_4 = arith.constant 0 : index
    %13 = vector.load %arg1[%c2, %c0_4] : memref<3x1792xf32, #tpu.memory_space<vmem>>, vector<1x1792xf32>
    %14 = vector.broadcast %12 : vector<2x1xf32> to vector<2x1792xf32>
    %15 = vector.broadcast %13 : vector<1x1792xf32> to vector<2x1792xf32>
    %16 = arith.mulf %14, %15 : vector<2x1792xf32>
    %17 = arith.addf %11, %16 : vector<2x1792xf32>
    %c0_5 = arith.constant 0 : index
    %c0_6 = arith.constant 0 : index
    %18 = vector.load %arg2[%c0_5, %c0_6] : memref<1x1792xf32, #tpu.memory_space<vmem>>, vector<1x1792xf32>
    %19 = vector.broadcast %18 : vector<1x1792xf32> to vector<2x1792xf32>
    %20 = arith.addf %17, %19 : vector<2x1792xf32>
    %cst = arith.constant 0.000000e+00 : f32
    %21 = vector.broadcast %cst : f32 to vector<2x1792xf32>
    %22 = arith.maximumf %20, %21 : vector<2x1792xf32>
    %c0_7 = arith.constant 0 : index
    %c0_8 = arith.constant 0 : index
    %23 = vector.load %arg3[%c0_7, %c0_8] : memref<1792x160xf32, #tpu.memory_space<vmem>>, vector<1792x160xf32>
    %cst_9 = arith.constant dense<0.000000e+00> : vector<2x160xf32>
    %24 = tpu.matmul %22, %23, %cst_9 {dimension_numbers = #tpu.dot_dimension_numbers<[1], [0], [0], [1], [0, 0, 1, 1], [], []>} : vector<2x1792xf32>, vector<1792x160xf32>, vector<2x160xf32> -> vector<2x160xf32>
    %c0_10 = arith.constant 0 : index
    %c0_11 = arith.constant 0 : index
    %25 = vector.load %arg4[%c0_10, %c0_11] : memref<1x160xf32, #tpu.memory_space<vmem>>, vector<1x160xf32>
    %26 = vector.broadcast %25 : vector<1x160xf32> to vector<2x160xf32>
    %27 = arith.addf %24, %26 : vector<2x160xf32>
    %c0_12 = arith.constant 0 : index
    %c0_13 = arith.constant 0 : index
    %28 = vector.load %arg5[%c0_12, %c0_13] : memref<2x160xf32, #tpu.memory_space<vmem>>, vector<2x160xf32>
    tpu.vector_store %arg5[%c0_12, %c0_13], %27 {strides = array<i32>} : memref<2x160xf32, #tpu.memory_space<vmem>>, vector<2x160xf32>,
    return
  }
}

</mosaic_0001>

<bundles_post_ra>
// kernel: tpu_custom_call.1
= control target key start
LH: loop header
LB: loop body
LE: loop exit
PB: predicated region body
PF: predicated region fallthrough
CT: control target
= control target key end

     0   :  { %v1344_v2 = vmov 0   ;;  %v1345_v3 = vmov 2   ;;  %v1346_v21 = vmov 1   ;;  %s2991_s0 = inlined_call_operand.vmem [shape: f32[2,3], index: 0, kind: input, shape index: {}]   ;;  %s2992_s1 = inlined_call_operand.vmem [shape: f32[3,1792], index: 1, kind: input, shape index: {}]   ;;  %s2993_s2 = inlined_call_operand.vmem [shape: f32[1,1792], index: 2, kind: input, shape index: {}]   ;;  %s2994_s3 = inlined_call_operand.vmem [shape: f32[1792,160], index: 3, kind: input, shape index: {}]   ;;  %s2995_s4 = inlined_call_operand.vmem [shape: f32[1,160], index: 4, kind: input, shape index: {}]   ;;  %s2996_s5 = inlined_call_operand.hbm [shape: f32[2,160], index: 5, kind: output, shape index: {}]  }
   0x1   :  { %v21_v0 = vld [vmem:[%s2991_s0] sm:$0x3]  ;;  %v296_v1 = vld [vmem:[%s2994_s3 + $0xf0] sm:$0xff]  ;;  %1314 = vset.pattern.permute.xlu0 %v1344_v2  ;;  %1316 = vset.pattern.permute.xlu1 %v1345_v3 }
   0x2   :  { %v328_v4 = vld [vmem:[%s2994_s3 + $0x1f0] sm:$0xff]  ;;  %27 = vperm.xlu0 %1314, %v21_v0   ;;  %145 = vperm.xlu1 %1316, %v21_v0   ;;  %v294_v7 = vld [vmem:[%s2994_s3 + $0xe0] sm:$0xff] }
   0x3   :  { %v360_v5 = vld [vmem:[%s2994_s3 + $0x2f0] sm:$0xff]  ;;  %v326_v8 = vld [vmem:[%s2994_s3 + $0x1e0] sm:$0xff]  ;;  %720 = vmatpush.msra.mxu0 %v296_v1  ;;  %740 = vmatpush.msra.mxu1 %v328_v4 }
   0x4   :  { %v392_v6 = vld [vmem:[%s2994_s3 + $0x3f0] sm:$0xff]  ;;  %v358_v9 = vld [vmem:[%s2994_s3 + $0x2e0] sm:$0xff]  ;;  %760 = vmatpush.msra.mxu2 %v360_v5 }
   0x5   :  { %v390_v10 = vld [vmem:[%s2994_s3 + $0x3e0] sm:$0xff]  ;;  %780 = vmatpush.msra.mxu3 %v392_v6  ;;  %v292_v11 = vld [vmem:[%s2994_s3 + $0xd0] sm:$0xff]  ;;  %721 = vmatpush.msra.mxu0 %v294_v7 }
   0x6   :  { %v324_v12 = vld [vmem:[%s2994_s3 + $0x1d0] sm:$0xff]  ;;  %741 = vmatpush.msra.mxu1 %v326_v8  ;;  %761 = vmatpush.msra.mxu2 %v358_v9  ;;  %v290_v15 = vld [vmem:[%s2994_s3 + $0xc0] sm:$0xff] }
   0x7   :  { %v356_v13 = vld [vmem:[%s2994_s3 + $0x2d0] sm:$0xff]  ;;  %781 = vmatpush.msra.mxu3 %v390_v10  ;;  %v322_v16 = vld [vmem:[%s2994_s3 + $0x1c0] sm:$0xff]  ;;  %722 = vmatpush.msra.mxu0 %v292_v11 }
   0x8   :  { %v388_v14 = vld [vmem:[%s2994_s3 + $0x3d0] sm:$0xff]  ;;  %742 = vmatpush.msra.mxu1 %v324_v12  ;;  %v354_v17 = vld [vmem:[%s2994_s3 + $0x2c0] sm:$0xff]  ;;  %762 = vmatpush.msra.mxu2 %v356_v13 }
   0x9   :  { %782 = vmatpush.msra.mxu3 %v388_v14  ;;  %v386_v18 = vld [vmem:[%s2994_s3 + $0x3c0] sm:$0xff]  ;;  %723 = vmatpush.msra.mxu0 %v290_v15  ;;  %v288_v19 = vld [vmem:[%s2994_s3 + $0xb0] sm:$0xff] }
   0xa   :  { %743 = vmatpush.msra.mxu1 %v322_v16  ;;  %v320_v20 = vld [vmem:[%s2994_s3 + $0x1b0] sm:$0xff]  ;;  %1315 = vset.pattern.permute.xlu0 %v1346_v21  ;;  %v286_v24 = vld [vmem:[%s2994_s3 + $0xa0] sm:$0xff] }
   0xb   :  { %763 = vmatpush.msra.mxu2 %v354_v17  ;;  %v352_v22 = vld [vmem:[%s2994_s3 + $0x2b0] sm:$0xff]  ;;  %79 = vperm.xlu0 %1315, %v21_v0   ;;  %v318_v25 = vld [vmem:[%s2994_s3 + $0x1a0] sm:$0xff] }
   0xc   :  { %v384_v23 = vld [vmem:[%s2994_s3 + $0x3b0] sm:$0xff]  ;;  %783 = vmatpush.msra.mxu3 %v386_v18  ;;  %724 = vmatpush.msra.mxu0 %v288_v19  ;;  %v350_v26 = vld [vmem:[%s2994_s3 + $0x2a0] sm:$0xff] }
   0xd   :  { %744 = vmatpush.msra.mxu1 %v320_v20  ;;  %v382_v27 = vld [vmem:[%s2994_s3 + $0x3a0] sm:$0xff]  ;;  %764 = vmatpush.msra.mxu2 %v352_v22  ;;  %v284_v28 = vld [vmem:[%s2994_s3 + $0x90] sm:$0xff] }
   0xe   :  { %784 = vmatpush.msra.mxu3 %v384_v23  ;;  %v316_v29 = vld [vmem:[%s2994_s3 + $0x190] sm:$0xff]  ;;  %725 = vmatpush.msra.mxu0 %v286_v24  ;;  %v282_v32 = vld [vmem:[%s2994_s3 + $0x80] sm:$0xff] }
   0xf   :  { %745 = vmatpush.msra.mxu1 %v318_v25  ;;  %v348_v30 = vld [vmem:[%s2994_s3 + $0x290] sm:$0xff]  ;;  %765 = vmatpush.msra.mxu2 %v350_v26  ;;  %v314_v33 = vld [vmem:[%s2994_s3 + $0x180] sm:$0xff] }
  0x10   :  { %v380_v31 = vld [vmem:[%s2994_s3 + $0x390] sm:$0xff]  ;;  %785 = vmatpush.msra.mxu3 %v382_v27  ;;  %726 = vmatpush.msra.mxu0 %v284_v28  ;;  %v346_v34 = vld [vmem:[%s2994_s3 + $0x280] sm:$0xff] }
  0x11   :  { %746 = vmatpush.msra.mxu1 %v316_v29  ;;  %v378_v35 = vld [vmem:[%s2994_s3 + $0x380] sm:$0xff]  ;;  %766 = vmatpush.msra.mxu2 %v348_v30  ;;  %v280_v36 = vld [vmem:[%s2994_s3 + $0x70] sm:$0xff] }
  0x12   :  { %786 = vmatpush.msra.mxu3 %v380_v31  ;;  %v312_v37 = vld [vmem:[%s2994_s3 + $0x170] sm:$0xff]  ;;  %727 = vmatpush.msra.mxu0 %v282_v32  ;;  %v278_v40 = vld [vmem:[%s2994_s3 + $0x60] sm:$0xff] }
  0x13   :  { %747 = vmatpush.msra.mxu1 %v314_v33  ;;  %v344_v38 = vld [vmem:[%s2994_s3 + $0x270] sm:$0xff]  ;;  %767 = vmatpush.msra.mxu2 %v346_v34  ;;  %v310_v41 = vld [vmem:[%s2994_s3 + $0x160] sm:$0xff] }
  0x14   :  { %v376_v39 = vld [vmem:[%s2994_s3 + $0x370] sm:$0xff]  ;;  %787 = vmatpush.msra.mxu3 %v378_v35  ;;  %728 = vmatpush.msra.mxu0 %v280_v36  ;;  %v342_v42 = vld [vmem:[%s2994_s3 + $0x260] sm:$0xff] }
  0x15   :  { %748 = vmatpush.msra.mxu1 %v312_v37  ;;  %v374_v43 = vld [vmem:[%s2994_s3 + $0x360] sm:$0xff]  ;;  %768 = vmatpush.msra.mxu2 %v344_v38  ;;  %v276_v44 = vld [vmem:[%s2994_s3 + $0x50] sm:$0xff] }
  0x16   :  { %788 = vmatpush.msra.mxu3 %v376_v39  ;;  %v308_v45 = vld [vmem:[%s2994_s3 + $0x150] sm:$0xff]  ;;  %729 = vmatpush.msra.mxu0 %v278_v40  ;;  %v274_v48 = vld [vmem:[%s2994_s3 + $0x40] sm:$0xff] }
  0x17   :  { %749 = vmatpush.msra.mxu1 %v310_v41  ;;  %v340_v46 = vld [vmem:[%s2994_s3 + $0x250] sm:$0xff]  ;;  %769 = vmatpush.msra.mxu2 %v342_v42  ;;  %v306_v49 = vld [vmem:[%s2994_s3 + $0x140] sm:$0xff] }
  0x18   :  { %v372_v47 = vld [vmem:[%s2994_s3 + $0x350] sm:$0xff]  ;;  %789 = vmatpush.msra.mxu3 %v374_v43  ;;  %730 = vmatpush.msra.mxu0 %v276_v44  ;;  %v338_v50 = vld [vmem:[%s2994_s3 + $0x240] sm:$0xff] }
  0x19   :  { %750 = vmatpush.msra.mxu1 %v308_v45  ;;  %v370_v51 = vld [vmem:[%s2994_s3 + $0x340] sm:$0xff]  ;;  %770 = vmatpush.msra.mxu2 %v340_v46  ;;  %v272_v52 = vld [vmem:[%s2994_s3 + $0x30] sm:$0xff] }
  0x1a   :  { %790 = vmatpush.msra.mxu3 %v372_v47  ;;  %v304_v53 = vld [vmem:[%s2994_s3 + $0x130] sm:$0xff]  ;;  %731 = vmatpush.msra.mxu0 %v274_v48  ;;  %v270_v56 = vld [vmem:[%s2994_s3 + $0x20] sm:$0xff] }
  0x1b   :  { %751 = vmatpush.msra.mxu1 %v306_v49  ;;  %v336_v54 = vld [vmem:[%s2994_s3 + $0x230] sm:$0xff]  ;;  %771 = vmatpush.msra.mxu2 %v338_v50  ;;  %v302_v57 = vld [vmem:[%s2994_s3 + $0x120] sm:$0xff] }
  0x1c   :  { %v368_v55 = vld [vmem:[%s2994_s3 + $0x330] sm:$0xff]  ;;  %791 = vmatpush.msra.mxu3 %v370_v51  ;;  %732 = vmatpush.msra.mxu0 %v272_v52  ;;  %v334_v58 = vld [vmem:[%s2994_s3 + $0x220] sm:$0xff] }
  0x1d   :  { %752 = vmatpush.msra.mxu1 %v304_v53  ;;  %v366_v59 = vld [vmem:[%s2994_s3 + $0x320] sm:$0xff]  ;;  %772 = vmatpush.msra.mxu2 %v336_v54  ;;  %v268_v60 = vld [vmem:[%s2994_s3 + $0x10] sm:$0xff] }
  0x1e   :  { %792 = vmatpush.msra.mxu3 %v368_v55  ;;  %v300_v61 = vld [vmem:[%s2994_s3 + $0x110] sm:$0xff]  ;;  %733 = vmatpush.msra.mxu0 %v270_v56 }
  0x1f   :  { %753 = vmatpush.msra.mxu1 %v302_v57  ;;  %v332_v62 = vld [vmem:[%s2994_s3 + $0x210] sm:$0xff] }
  0x20   :  { %v364_v63 = vld [vmem:[%s2994_s3 + $0x310] sm:$0xff] }
  0x21   :  { %10 = vsyncpa [#allocation3], 0  ;;  %773 = vmatpush.msra.mxu2 %v334_v58  ;;  %793 = vmatpush.msra.mxu3 %v366_v59  ;;  %v266_v0 = vld [vmem:[%s2994_s3] sm:$0xff]  ;;  %v424_v5 = vld [vmem:[%s2994_s3 + $0x4f0] sm:$0xff]  ;;  %vm1283_vm0 = vcmask 1041408   ;;  %vm1286_vm1 = vcmask 257026  }
  0x22   :  { %v298_v1 = vld [vmem:[%s2994_s3 + $0x100] sm:$0xff]  ;;  %734 = vmatpush.msra.mxu0 %v268_v60  ;;  %754 = vmatpush.msra.mxu1 %v300_v61  ;;  %v456_v6 = vld [vmem:[%s2994_s3 + $0x5f0] sm:$0xff]  ;;  %s1296_s8 = sshll.u32 %s2996_s5, 4  ;;  %vm1287_vm2 = vmor %vm1286_vm1, %vm1283_vm0  ;;  %s1297_s8 = int_to_ptr.hbm [resolvable:$true] %s1296_s8 }
  0x23   :  { %v330_v2 = vld [vmem:[%s2994_s3 + $0x200] sm:$0xff]  ;;  %774 = vmatpush.msra.mxu2 %v332_v62  ;;  %794 = vmatpush.msra.mxu3 %v364_v63  ;;  %v488_v7 = vld [vmem:[%s2994_s3 + $0x6f0] sm:$0xff] }
  0x24   :  { %v362_v4 = vld [vmem:[%s2994_s3 + $0x300] sm:$0xff]  ;;  %735 = vmatpush.msra.mxu0 %v266_v0  ;;  %755 = vmatpush.msra.mxu1 %v298_v1  ;;  %v520_v8 = vld [vmem:[%s2994_s3 + $0x7f0] sm:$0xff] }
  0x25   :  { %775 = vmatpush.msra.mxu2 %v330_v2  ;;  %795 = vmatpush.msra.mxu3 %v362_v4  ;;  %v422_v9 = vld [vmem:[%s2994_s3 + $0x4e0] sm:$0xff]  ;;  %v420_v13 = vld [vmem:[%s2994_s3 + $0x4d0] sm:$0xff] }
  0x26   :  { %v454_v10 = vld [vmem:[%s2994_s3 + $0x5e0] sm:$0xff]  ;;  %800 = vmatpush.msrb.mxu0 %v424_v5  ;;  %820 = vmatpush.msrb.mxu1 %v456_v6  ;;  %v452_v14 = vld [vmem:[%s2994_s3 + $0x5d0] sm:$0xff] }
  0x27   :  { %v486_v11 = vld [vmem:[%s2994_s3 + $0x6e0] sm:$0xff]  ;;  %840 = vmatpush.msrb.mxu2 %v488_v7  ;;  %860 = vmatpush.msrb.mxu3 %v520_v8  ;;  %v484_v15 = vld [vmem:[%s2994_s3 + $0x6d0] sm:$0xff] }
  0x28   :  { %v518_v12 = vld [vmem:[%s2994_s3 + $0x7e0] sm:$0xff]  ;;  %801 = vmatpush.msrb.mxu0 %v422_v9  ;;  %821 = vmatpush.msrb.mxu1 %v454_v10  ;;  %v516_v16 = vld [vmem:[%s2994_s3 + $0x7d0] sm:$0xff] }
  0x29   :  { %841 = vmatpush.msrb.mxu2 %v486_v11  ;;  %861 = vmatpush.msrb.mxu3 %v518_v12  ;;  %v418_v17 = vld [vmem:[%s2994_s3 + $0x4c0] sm:$0xff]  ;;  %v416_v21 = vld [vmem:[%s2994_s3 + $0x4b0] sm:$0xff] }
  0x2a   :  { %v450_v18 = vld [vmem:[%s2994_s3 + $0x5c0] sm:$0xff]  ;;  %802 = vmatpush.msrb.mxu0 %v420_v13  ;;  %822 = vmatpush.msrb.mxu1 %v452_v14  ;;  %v448_v22 = vld [vmem:[%s2994_s3 + $0x5b0] sm:$0xff] }
  0x2b   :  { %v482_v19 = vld [vmem:[%s2994_s3 + $0x6c0] sm:$0xff]  ;;  %842 = vmatpush.msrb.mxu2 %v484_v15  ;;  %862 = vmatpush.msrb.mxu3 %v516_v16  ;;  %v480_v23 = vld [vmem:[%s2994_s3 + $0x6b0] sm:$0xff] }
  0x2c   :  { %v514_v20 = vld [vmem:[%s2994_s3 + $0x7c0] sm:$0xff]  ;;  %803 = vmatpush.msrb.mxu0 %v418_v17  ;;  %823 = vmatpush.msrb.mxu1 %v450_v18  ;;  %v512_v24 = vld [vmem:[%s2994_s3 + $0x7b0] sm:$0xff] }
  0x2d   :  { %843 = vmatpush.msrb.mxu2 %v482_v19  ;;  %863 = vmatpush.msrb.mxu3 %v514_v20  ;;  %v414_v25 = vld [vmem:[%s2994_s3 + $0x4a0] sm:$0xff]  ;;  %v412_v29 = vld [vmem:[%s2994_s3 + $0x490] sm:$0xff] }
  0x2e   :  { %v446_v26 = vld [vmem:[%s2994_s3 + $0x5a0] sm:$0xff]  ;;  %804 = vmatpush.msrb.mxu0 %v416_v21  ;;  %824 = vmatpush.msrb.mxu1 %v448_v22  ;;  %v444_v30 = vld [vmem:[%s2994_s3 + $0x590] sm:$0xff] }
  0x2f   :  { %v478_v27 = vld [vmem:[%s2994_s3 + $0x6a0] sm:$0xff]  ;;  %844 = vmatpush.msrb.mxu2 %v480_v23  ;;  %864 = vmatpush.msrb.mxu3 %v512_v24  ;;  %v476_v31 = vld [vmem:[%s2994_s3 + $0x690] sm:$0xff] }
  0x30   :  { %v510_v28 = vld [vmem:[%s2994_s3 + $0x7a0] sm:$0xff]  ;;  %805 = vmatpush.msrb.mxu0 %v414_v25  ;;  %825 = vmatpush.msrb.mxu1 %v446_v26  ;;  %v508_v32 = vld [vmem:[%s2994_s3 + $0x790] sm:$0xff] }
  0x31   :  { %845 = vmatpush.msrb.mxu2 %v478_v27  ;;  %865 = vmatpush.msrb.mxu3 %v510_v28  ;;  %v442_v33 = vld [vmem:[%s2994_s3 + $0x580] sm:$0xff]  ;;  %v408_v36 = vld [vmem:[%s2994_s3 + $0x470] sm:$0xff] }
  0x32   :  { %1317 = vset.pattern.permute.xlu0 %v1345_v3  ;;  %806 = vmatpush.msrb.mxu0 %v412_v29  ;;  %v410_v3 = vld [vmem:[%s2994_s3 + $0x480] sm:$0xff]  ;;  %v440_v37 = vld [vmem:[%s2994_s3 + $0x570] sm:$0xff] }
  0x33   :  { %826 = vmatpush.msrb.mxu1 %v444_v30  ;;  %846 = vmatpush.msrb.mxu2 %v476_v31  ;;  %v474_v34 = vld [vmem:[%s2994_s3 + $0x680] sm:$0xff]  ;;  %v472_v38 = vld [vmem:[%s2994_s3 + $0x670] sm:$0xff] }
  0x34   :  { %866 = vmatpush.msrb.mxu3 %v508_v32  ;;  %v506_v35 = vld [vmem:[%s2994_s3 + $0x780] sm:$0xff]  ;;  %807 = vmatpush.msrb.mxu0 %v410_v3  ;;  %v504_v39 = vld [vmem:[%s2994_s3 + $0x770] sm:$0xff] }
  0x35   :  { %827 = vmatpush.msrb.mxu1 %v442_v33  ;;  %847 = vmatpush.msrb.mxu2 %v474_v34  ;;  %v406_v40 = vld [vmem:[%s2994_s3 + $0x460] sm:$0xff]  ;;  %v404_v44 = vld [vmem:[%s2994_s3 + $0x450] sm:$0xff] }
  0x36   :  { %867 = vmatpush.msrb.mxu3 %v506_v35  ;;  %v438_v41 = vld [vmem:[%s2994_s3 + $0x560] sm:$0xff]  ;;  %808 = vmatpush.msrb.mxu0 %v408_v36  ;;  %v436_v45 = vld [vmem:[%s2994_s3 + $0x550] sm:$0xff] }
  0x37   :  { %828 = vmatpush.msrb.mxu1 %v440_v37  ;;  %v470_v42 = vld [vmem:[%s2994_s3 + $0x660] sm:$0xff]  ;;  %848 = vmatpush.msrb.mxu2 %v472_v38  ;;  %v468_v46 = vld [vmem:[%s2994_s3 + $0x650] sm:$0xff] }
  0x38   :  { %v502_v43 = vld [vmem:[%s2994_s3 + $0x760] sm:$0xff]  ;;  %868 = vmatpush.msrb.mxu3 %v504_v39  ;;  %809 = vmatpush.msrb.mxu0 %v406_v40  ;;  %v500_v47 = vld [vmem:[%s2994_s3 + $0x750] sm:$0xff] }
  0x39   :  { %829 = vmatpush.msrb.mxu1 %v438_v41  ;;  %849 = vmatpush.msrb.mxu2 %v470_v42  ;;  %v402_v48 = vld [vmem:[%s2994_s3 + $0x440] sm:$0xff]  ;;  %v400_v52 = vld [vmem:[%s2994_s3 + $0x430] sm:$0xff] }
  0x3a   :  { %869 = vmatpush.msrb.mxu3 %v502_v43  ;;  %810 = vmatpush.msrb.mxu0 %v404_v44  ;;  %v434_v49 = vld [vmem:[%s2994_s3 + $0x540] sm:$0xff]  ;;  %v432_v53 = vld [vmem:[%s2994_s3 + $0x530] sm:$0xff] }
  0x3b   :  { %830 = vmatpush.msrb.mxu1 %v436_v45  ;;  %v466_v50 = vld [vmem:[%s2994_s3 + $0x640] sm:$0xff]  ;;  %850 = vmatpush.msrb.mxu2 %v468_v46  ;;  %v464_v54 = vld [vmem:[%s2994_s3 + $0x630] sm:$0xff] }
  0x3c   :  { %870 = vmatpush.msrb.mxu3 %v500_v47  ;;  %v498_v51 = vld [vmem:[%s2994_s3 + $0x740] sm:$0xff]  ;;  %811 = vmatpush.msrb.mxu0 %v402_v48  ;;  %v496_v55 = vld [vmem:[%s2994_s3 + $0x730] sm:$0xff] }
  0x3d   :  { %831 = vmatpush.msrb.mxu1 %v434_v49  ;;  %851 = vmatpush.msrb.mxu2 %v466_v50  ;;  %v398_v56 = vld [vmem:[%s2994_s3 + $0x420] sm:$0xff]  ;;  %v396_v60 = vld [vmem:[%s2994_s3 + $0x410] sm:$0xff] }
  0x3e   :  { %871 = vmatpush.msrb.mxu3 %v498_v51  ;;  %v430_v57 = vld [vmem:[%s2994_s3 + $0x520] sm:$0xff]  ;;  %812 = vmatpush.msrb.mxu0 %v400_v52  ;;  %v428_v61 = vld [vmem:[%s2994_s3 + $0x510] sm:$0xff] }
  0x3f   :  { %832 = vmatpush.msrb.mxu1 %v432_v53  ;;  %v462_v58 = vld [vmem:[%s2994_s3 + $0x620] sm:$0xff]  ;;  %852 = vmatpush.msrb.mxu2 %v464_v54  ;;  %v460_v62 = vld [vmem:[%s2994_s3 + $0x610] sm:$0xff] }
  0x40   :  { %v494_v59 = vld [vmem:[%s2994_s3 + $0x720] sm:$0xff]  ;;  %872 = vmatpush.msrb.mxu3 %v496_v55  ;;  %813 = vmatpush.msrb.mxu0 %v398_v56  ;;  %v492_v63 = vld [vmem:[%s2994_s3 + $0x710] sm:$0xff] }
  0x41   :  { %833 = vmatpush.msrb.mxu1 %v430_v57  ;;  %853 = vmatpush.msrb.mxu2 %v462_v58  ;;  %v394_v0 = vld [vmem:[%s2994_s3 + $0x400] sm:$0xff] }
  0x42   :  { %873 = vmatpush.msrb.mxu3 %v494_v59  ;;  %v426_v1 = vld [vmem:[%s2994_s3 + $0x500] sm:$0xff]  ;;  %814 = vmatpush.msrb.mxu0 %v396_v60 }
  0x43   :  { %834 = vmatpush.msrb.mxu1 %v428_v61  ;;  %v458_v2 = vld [vmem:[%s2994_s3 + $0x600] sm:$0xff]  ;;  %854 = vmatpush.msrb.mxu2 %v460_v62 }
  0x44   :  { %v490_v4 = vld [vmem:[%s2994_s3 + $0x700] sm:$0xff]  ;;  %874 = vmatpush.msrb.mxu3 %v492_v63  ;;  %815 = vmatpush.msrb.mxu0 %v394_v0 }
  0x45   :  { %835 = vmatpush.msrb.mxu1 %v426_v1  ;;  %855 = vmatpush.msrb.mxu2 %v458_v2  ;;  %v1770_v5 = vld [vmem:[%s2992_s1] ss:$4 sm:$0xff]  ;;  %v1775_v6 = vld [vmem:[%s2992_s1 + $0x1] ss:$4 sm:$0xff]  ;;  %v1793_v15 = vld [vmem:[%s2992_s1 + $0x2] ss:$4 sm:$0xff] }
  0x46   :  { %875 = vmatpush.msrb.mxu3 %v490_v4  ;;  %v32_v7 = vperm.slane %v1770_v5, 0  ;;  %v1781_v8 = vld [vmem:[%s2992_s1 + $0x20] ss:$4 sm:$0x3f]  ;;  %v33_v9 = vperm.slane %v1770_v5, 1  ;;  %v34_v10 = vperm.slane %v1770_v5, 2 }
  0x47   :  { %v35_v11 = vperm.slane %v1770_v5, 3  ;;  %v36_v12 = vperm.slane %v1770_v5, 4  ;;  %v84_v14 = vperm.slane %v1775_v6, 0  ;;  %v37_v16 = vperm.slane %v1770_v5, 5  ;;  %v1801_v19 = vld [vmem:[%s2993_s2] sm:$0xff] }
  0x48   :  { %v38_v17 = vperm.slane %v1770_v5, 6  ;;  %v39_v18 = vperm.slane %v1770_v5, 7  ;;  %v85_v20 = vperm.slane %v1775_v6, 1  ;;  %v86_v21 = vperm.slane %v1775_v6, 2 }
  0x49   :  { %v87_v22 = vperm.slane %v1775_v6, 3  ;;  %v44_v23 = vperm.slane %v1781_v8, 4  ;;  %v88_v24 = vperm.slane %v1775_v6, 4  ;;  %v89_v25 = vperm.slane %v1775_v6, 5 }
  0x4a   :  { %v90_v26 = vperm.slane %v1775_v6, 6  ;;  %v91_v27 = vperm.slane %v1775_v6, 7  ;;  %v150_v28 = vperm.slane %v1793_v15, 0  ;;  %v151_v29 = vperm.slane %v1793_v15, 1 }
  0x4b   :  { %v152_v30 = vperm.slane %v1793_v15, 2  ;;  %v45_v31 = vperm.slane %v1781_v8, 5  ;;  %v210_v3 = vperm.slane %v1801_v19, 0  ;;  %v211_v33 = vperm.slane %v1801_v19, 1 }
  0x4c   :  { %v153_v34 = vperm.slane %v1793_v15, 3  ;;  %v1823_v35 = vld [vmem:[%s2992_s1 + $0x22] ss:$4 sm:$0x3f]  ;;  %v212_v36 = vperm.slane %v1801_v19, 2  ;;  %v213_v37 = vperm.slane %v1801_v19, 3 }
  0x4d   :  { %v154_v38 = vperm.slane %v1793_v15, 4  ;;  %v214_v39 = vperm.slane %v1801_v19, 4  ;;  %v155_v40 = vperm.slane %v1793_v15, 5  ;;  %v215_v41 = vperm.slane %v1801_v19, 5 }
  0x4e   :  { %v156_v42 = vperm.slane %v1793_v15, 6  ;;  %v157_v43 = vperm.slane %v1793_v15, 7  ;;  %v162_v46 = vperm.slane %v1823_v35, 4  ;;  %v163_v47 = vperm.slane %v1823_v35, 5 }
  0x74   :  { %v1787_v13 = vpop.permute.xlu0 %27  ;;  %v1815_v32 = vpop.permute.xlu1 %145 }
  0x75   :  { %v60_v44 = vmul.f32 %v32_v7, %v1787_v13  ;;  %v178_v45 = vmul.f32 %v150_v28, %v1815_v32  ;;  %v61_v48 = vmul.f32 %v33_v9, %v1787_v13  ;;  %v179_v49 = vmul.f32 %v151_v29, %v1815_v32 }
  0x76   :  { %v62_v50 = vmul.f32 %v34_v10, %v1787_v13  ;;  %v180_v51 = vmul.f32 %v152_v30, %v1815_v32  ;;  %v63_v53 = vmul.f32 %v35_v11, %v1787_v13  ;;  %v181_v54 = vmul.f32 %v153_v34, %v1815_v32 }
  0x77   :  { %v64_v55 = vmul.f32 %v36_v12, %v1787_v13  ;;  %v182_v56 = vmul.f32 %v154_v38, %v1815_v32  ;;  %v65_v62 = vmul.f32 %v37_v16, %v1787_v13  ;;  %v183_v7 = vmul.f32 %v155_v40, %v1815_v32 }
  0x78   :  { %v66_v9 = vmul.f32 %v38_v17, %v1787_v13  ;;  %v184_v10 = vmul.f32 %v156_v42, %v1815_v32  ;;  %v67_v17 = vmul.f32 %v39_v18, %v1787_v13  ;;  %v185_v30 = vmul.f32 %v157_v43, %v1815_v32 }
  0x79   :  { %v190_v42 = vmul.f32 %v162_v46, %v1815_v32  ;;  %v73_v43 = vmul.f32 %v45_v31, %v1787_v13  ;;  %v216_v31 = vperm.slane %v1801_v19, 6 }
  0x7d   :  { %v1841_v52 = vpop.permute.xlu0 %79 }
  0x7e   :  { %v112_v57 = vmul.f32 %v84_v14, %v1841_v52  ;;  %v113_v58 = vmul.f32 %v85_v20, %v1841_v52  ;;  %v114_v59 = vmul.f32 %v86_v21, %v1841_v52  ;;  %v115_v60 = vmul.f32 %v87_v22, %v1841_v52  ;;  %v1862_v20 = vld [vmem:[%s2992_s1 + $0x21] ss:$4 sm:$0x3f] }
  0x7f   :  { %v116_v61 = vmul.f32 %v88_v24, %v1841_v52  ;;  %v117_v63 = vmul.f32 %v89_v25, %v1841_v52  ;;  %v118_v0 = vmul.f32 %v90_v26, %v1841_v52  ;;  %v119_v11 = vmul.f32 %v91_v27, %v1841_v52 }
  0x80   :  { %v126_v1 = vadd.f32 %v112_v57, %v60_v44  ;;  %v127_v2 = vadd.f32 %v113_v58, %v61_v48  ;;  %v128_v4 = vadd.f32 %v114_v59, %v62_v50  ;;  %v129_v6 = vadd.f32 %v115_v60, %v63_v53  ;;  %v582_v50 = vld [vmem:[%s2994_s3 + $0x9e0] sm:$0xff]  ;;  %v548_v58 = vld [vmem:[%s2994_s3 + $0x8d0] sm:$0xff] }
  0x81   :  { %v130_v21 = vadd.f32 %v116_v61, %v64_v55  ;;  %v131_v22 = vadd.f32 %v117_v63, %v65_v62  ;;  %v132_v24 = vadd.f32 %v118_v0, %v66_v9  ;;  %v133_v29 = vadd.f32 %v119_v11, %v67_v17  ;;  %v646_v57 = vld [vmem:[%s2994_s3 + $0xbe0] sm:$0xff]  ;;  %v580_v59 = vld [vmem:[%s2994_s3 + $0x9d0] sm:$0xff] }
  0x82   :  { %v192_v12 = vadd.f32 %v178_v45, %v126_v1  ;;  %v193_v14 = vadd.f32 %v179_v49, %v127_v2  ;;  %v194_v15 = vadd.f32 %v180_v51, %v128_v4  ;;  %v195_v16 = vadd.f32 %v181_v54, %v129_v6  ;;  %v616_v45 = vld [vmem:[%s2994_s3 + $0xaf0] sm:$0xff]  ;;  %v546_v4 = vld [vmem:[%s2994_s3 + $0x8c0] sm:$0xff] }
  0x83   :  { %v96_v34 = vperm.slane %v1862_v20, 4  ;;  %v97_v38 = vperm.slane %v1862_v20, 5  ;;  %v191_v44 = vmul.f32 %v163_v47, %v1815_v32  ;;  %v196_v46 = vadd.f32 %v182_v56, %v130_v21  ;;  %v550_v47 = vld [vmem:[%s2994_s3 + $0x8e0] sm:$0xff]  ;;  %v612_v62 = vld [vmem:[%s2994_s3 + $0xad0] sm:$0xff] }
  0x84   :  { %v1867_v25 = vadd.f32 %v210_v3, %v192_v12  ;;  %v1869_v26 = vadd.f32 %v211_v33, %v193_v14  ;;  %v1871_v27 = vadd.f32 %v212_v36, %v194_v15  ;;  %v1873_v28 = vadd.f32 %v213_v37, %v195_v16  ;;  %v552_v33 = vld [vmem:[%s2994_s3 + $0x8f0] sm:$0xff]  ;;  %v614_v56 = vld [vmem:[%s2994_s3 + $0xae0] sm:$0xff] }
  0x85   :  { %v584_v36 = vld [vmem:[%s2994_s3 + $0x9f0] sm:$0xff]  ;;  %v72_v37 = vmul.f32 %v44_v23, %v1787_v13  ;;  %v197_v48 = vadd.f32 %v183_v7, %v131_v22  ;;  %v198_v49 = vadd.f32 %v184_v10, %v132_v24  ;;  %v199_v51 = vadd.f32 %v185_v30, %v133_v29  ;;  %v578_v6 = vld [vmem:[%s2994_s3 + $0x9c0] sm:$0xff] }
  0x86   :  { %v252_v40 = vmax.f32 %v1867_v25, 0.0  ;;  %v253_v5 = vmax.f32 %v1869_v26, 0.0  ;;  %v254_v18 = vmax.f32 %v1871_v27, 0.0  ;;  %v255_v3 = vmax.f32 %v1873_v28, 0.0  ;;  %v648_v23 = vld [vmem:[%s2994_s3 + $0xbf0] sm:$0xff]  ;;  %v542_v24 = vld [vmem:[%s2994_s3 + $0x8a0] sm:$0xff] }
  0x87   :  { %v217_v53 = vperm.slane %v1801_v19, 7  ;;  %v124_v54 = vmul.f32 %v96_v34, %v1841_v52  ;;  %v125_v55 = vmul.f32 %v97_v38, %v1841_v52  ;;  %v644_v63 = vld [vmem:[%s2994_s3 + $0xbd0] sm:$0xff]  ;;  %v1940_v0 = vadd.f32 %v214_v39, %v196_v46  ;;  %v610_v19 = vld [vmem:[%s2994_s3 + $0xac0] sm:$0xff]  ;;  %v455_v25 = vld [vmem:[%s2994_s3 + $0x5e8] sm:$0xff] }
  0x88   :  { %736 = vmatmul.f32.vlgmr.msra.gmra.mxu0 %v252_v40  ;;  %756 = vmatmul.f32.vlgmr.msra.gmra.mxu1 %v253_v5  ;;  %v1944_v1 = vadd.f32 %v215_v41, %v197_v48  ;;  %v1946_v2 = vadd.f32 %v216_v31, %v198_v49  ;;  %v642_v41 = vld [vmem:[%s2994_s3 + $0xbc0] sm:$0xff]  ;;  %v544_v15 = vld [vmem:[%s2994_s3 + $0x8b0] sm:$0xff]  ;;  %v40_v49 = vperm.slane %v1781_v8, 0  ;;  %v158_v31 = vperm.slane %v1823_v35, 0  ;;  %v357_v26 = vld [vmem:[%s2994_s3 + $0x2d8] sm:$0xff] }
  0x89   :  { %776 = vmatmul.f32.vlgmr.msra.gmra.mxu2 %v254_v18  ;;  %796 = vmatmul.f32.vlgmr.msra.gmra.mxu3 %v255_v3  ;;  %v138_v60 = vadd.f32 %v124_v54, %v72_v37  ;;  %v139_v61 = vadd.f32 %v125_v55, %v73_v43  ;;  %v1954_v7 = vadd.f32 %v217_v53, %v199_v51  ;;  %v256_v10 = vmax.f32 %v1940_v0, 0.0  ;;  %v576_v16 = vld [vmem:[%s2994_s3 + $0x9b0] sm:$0xff]  ;;  %v574_v17 = vld [vmem:[%s2994_s3 + $0x9a0] sm:$0xff]  ;;  %v487_v27 = vld [vmem:[%s2994_s3 + $0x6e8] sm:$0xff] }
  0x8a   :  { %880 = vmatpush.msra.mxu0 %v552_v33  ;;  %900 = vmatpush.msra.mxu1 %v584_v36  ;;  %v257_v11 = vmax.f32 %v1944_v1, 0.0  ;;  %v258_v12 = vmax.f32 %v1946_v2, 0.0  ;;  %v608_v21 = vld [vmem:[%s2994_s3 + $0xab0] sm:$0xff]  ;;  %v606_v29 = vld [vmem:[%s2994_s3 + $0xaa0] sm:$0xff]  ;;  %v92_v37 = vperm.slane %v1862_v20, 0  ;;  %v159_v51 = vperm.slane %v1823_v35, 1 }
  0x8b   :  { %920 = vmatpush.msra.mxu2 %v616_v45  ;;  %940 = vmatpush.msra.mxu3 %v648_v23  ;;  %v1956_v39 = vadd.f32 %v190_v42, %v138_v60  ;;  %v1958_v9 = vadd.f32 %v191_v44, %v139_v61  ;;  %v259_v14 = vmax.f32 %v1954_v7, 0.0  ;;  %v640_v22 = vld [vmem:[%s2994_s3 + $0xbb0] sm:$0xff]  ;;  %v638_v30 = vld [vmem:[%s2994_s3 + $0xba0] sm:$0xff]  ;;  %v93_v42 = vperm.slane %v1862_v20, 1  ;;  %v519_v28 = vld [vmem:[%s2994_s3 + $0x7e8] sm:$0xff] }
  0x8c   :  { %881 = vmatpush.msra.mxu0 %v550_v47  ;;  %901 = vmatpush.msra.mxu1 %v582_v50  ;;  %v540_v34 = vld [vmem:[%s2994_s3 + $0x890] sm:$0xff]  ;;  %v538_v43 = vld [vmem:[%s2994_s3 + $0x880] sm:$0xff]  ;;  %v94_v45 = vperm.slane %v1862_v20, 2  ;;  %v95_v23 = vperm.slane %v1862_v20, 3  ;;  %v41_v47 = vperm.slane %v1781_v8, 1  ;;  %v42_v53 = vperm.slane %v1781_v8, 2 }
  0x8d   :  { %921 = vmatpush.msra.mxu2 %v614_v56  ;;  %941 = vmatpush.msra.mxu3 %v646_v57  ;;  %v572_v38 = vld [vmem:[%s2994_s3 + $0x990] sm:$0xff]  ;;  %v570_v44 = vld [vmem:[%s2994_s3 + $0x980] sm:$0xff]  ;;  %v43_v54 = vperm.slane %v1781_v8, 3  ;;  %v120_v57 = vmul.f32 %v92_v37, %v1841_v52  ;;  %v485_v0 = vld [vmem:[%s2994_s3 + $0x6d8] sm:$0xff] }
  0x8e   :  { %882 = vmatpush.msra.mxu0 %v548_v58  ;;  %902 = vmatpush.msra.mxu1 %v580_v59  ;;  %v604_v33 = vld [vmem:[%s2994_s3 + $0xa90] sm:$0xff]  ;;  %v602_v46 = vld [vmem:[%s2994_s3 + $0xa80] sm:$0xff]  ;;  %v121_v58 = vmul.f32 %v93_v42, %v1841_v52  ;;  %v160_v59 = vperm.slane %v1823_v35, 2  ;;  %v122_v61 = vmul.f32 %v94_v45, %v1841_v52  ;;  %v517_v1 = vld [vmem:[%s2994_s3 + $0x7d8] sm:$0xff] }
  0x8f   :  { %922 = vmatpush.msra.mxu2 %v612_v62  ;;  %942 = vmatpush.msra.mxu3 %v644_v63  ;;  %v636_v36 = vld [vmem:[%s2994_s3 + $0xb90] sm:$0xff]  ;;  %v634_v48 = vld [vmem:[%s2994_s3 + $0xb80] sm:$0xff]  ;;  %v123_v62 = vmul.f32 %v95_v23, %v1841_v52  ;;  %v161_v63 = vperm.slane %v1823_v35, 3  ;;  %v615_v2 = vld [vmem:[%s2994_s3 + $0xae8] sm:$0xff] }
  0x90   :  { %883 = vmatpush.msra.mxu0 %v546_v4  ;;  %903 = vmatpush.msra.mxu1 %v578_v6  ;;  %v536_v20 = vld [vmem:[%s2994_s3 + $0x870] sm:$0xff]  ;;  %v534_v8 = vld [vmem:[%s2994_s3 + $0x860] sm:$0xff]  ;;  %v647_v7 = vld [vmem:[%s2994_s3 + $0xbe8] sm:$0xff] }
  0x91   :  { %923 = vmatpush.msra.mxu2 %v610_v19  ;;  %943 = vmatpush.msra.mxu3 %v642_v41  ;;  %v568_v50 = vld [vmem:[%s2994_s3 + $0x970] sm:$0xff]  ;;  %v566_v60 = vld [vmem:[%s2994_s3 + $0x960] sm:$0xff]  ;;  %v68_v19 = vmul.f32 %v40_v49, %v1787_v13  ;;  %v186_v41 = vmul.f32 %v158_v31, %v1815_v32  ;;  %v189_v42 = vmul.f32 %v161_v63, %v1815_v32 }
  0x92   :  { %816 = vmatmul.f32.vlgmr.msrb.gmra.mxu0 %v256_v10  ;;  %836 = vmatmul.f32.vlgmr.msrb.gmra.mxu1 %v257_v11  ;;  %v600_v55 = vld [vmem:[%s2994_s3 + $0xa70] sm:$0xff]  ;;  %v598_v4 = vld [vmem:[%s2994_s3 + $0xa60] sm:$0xff] }
  0x93   :  { %856 = vmatmul.f32.vlgmr.msrb.gmra.mxu2 %v258_v12  ;;  %876 = vmatmul.f32.vlgmr.msrb.gmra.mxu3 %v259_v14  ;;  %v632_v56 = vld [vmem:[%s2994_s3 + $0xb70] sm:$0xff]  ;;  %v630_v6 = vld [vmem:[%s2994_s3 + $0xb60] sm:$0xff] }
  0x94   :  { %884 = vmatpush.msra.mxu0 %v544_v15  ;;  %904 = vmatpush.msra.mxu1 %v576_v16  ;;  %v69_v15 = vmul.f32 %v41_v47, %v1787_v13  ;;  %v532_v35 = vld [vmem:[%s2994_s3 + $0x850] sm:$0xff]  ;;  %v187_v16 = vmul.f32 %v159_v51, %v1815_v32  ;;  %v522_v63 = vld [vmem:[%s2994_s3 + $0x800] sm:$0xff] }
  0x95   :  { %924 = vmatpush.msra.mxu2 %v608_v21  ;;  %944 = vmatpush.msra.mxu3 %v640_v22  ;;  %v564_v52 = vld [vmem:[%s2994_s3 + $0x950] sm:$0xff]  ;;  %v70_v21 = vmul.f32 %v42_v53, %v1787_v13  ;;  %v71_v22 = vmul.f32 %v43_v54, %v1787_v13  ;;  %v530_v13 = vld [vmem:[%s2994_s3 + $0x840] sm:$0xff] }
  0x96   :  { %885 = vmatpush.msra.mxu0 %v542_v24  ;;  %905 = vmatpush.msra.mxu1 %v574_v17  ;;  %v596_v24 = vld [vmem:[%s2994_s3 + $0xa50] sm:$0xff] }
  0x97   :  { %925 = vmatpush.msra.mxu2 %v606_v29  ;;  %945 = vmatpush.msra.mxu3 %v638_v30  ;;  %v628_v17 = vld [vmem:[%s2994_s3 + $0xb50] sm:$0xff]  ;;  %v134_v29 = vadd.f32 %v120_v57, %v68_v19  ;;  %v135_v30 = vadd.f32 %v121_v58, %v69_v15  ;;  %v137_v37 = vadd.f32 %v123_v62, %v71_v22  ;;  %v622_v57 = vld [vmem:[%s2994_s3 + $0xb20] sm:$0xff] }
  0x98   :  { %886 = vmatpush.msra.mxu0 %v540_v34  ;;  %906 = vmatpush.msra.mxu1 %v572_v38  ;;  %v188_v34 = vmul.f32 %v160_v59, %v1815_v32  ;;  %v562_v38 = vld [vmem:[%s2994_s3 + $0x940] sm:$0xff]  ;;  %v528_v45 = vld [vmem:[%s2994_s3 + $0x830] sm:$0xff] }
  0x99   :  { %926 = vmatpush.msra.mxu2 %v604_v33  ;;  %946 = vmatpush.msra.mxu3 %v636_v36  ;;  %v2094_v33 = vld [vmem:[%s2993_s2 + $0x8] sm:$0x3f]  ;;  %v136_v36 = vadd.f32 %v122_v61, %v70_v21  ;;  %v560_v32 = vld [vmem:[%s2994_s3 + $0x930] sm:$0xff]  ;;  %v201_v31 = vadd.f32 %v187_v16, %v135_v30  ;;  %v203_v54 = vadd.f32 %v189_v42, %v137_v37  ;;  %v618_v15 = vld [vmem:[%s2994_s3 + $0xb00] sm:$0xff] }
  0x9a   :  { %887 = vmatpush.msra.mxu0 %v538_v43  ;;  %907 = vmatpush.msra.mxu1 %v570_v44  ;;  %v594_v43 = vld [vmem:[%s2994_s3 + $0xa40] sm:$0xff]  ;;  %v592_v23 = vld [vmem:[%s2994_s3 + $0xa30] sm:$0xff]  ;;  %v218_v49 = vperm.slane %v2094_v33, 0  ;;  %v219_v47 = vperm.slane %v2094_v33, 1  ;;  %v220_v53 = vperm.slane %v2094_v33, 2  ;;  %v293_v42 = vld [vmem:[%s2994_s3 + $0xd8] sm:$0xff] }
  0x9b   :  { %927 = vmatpush.msra.mxu2 %v602_v46  ;;  %947 = vmatpush.msra.mxu3 %v634_v48  ;;  %v626_v44 = vld [vmem:[%s2994_s3 + $0xb40] sm:$0xff]  ;;  %v624_v46 = vld [vmem:[%s2994_s3 + $0xb30] sm:$0xff]  ;;  %v200_v48 = vadd.f32 %v186_v41, %v134_v29  ;;  %v202_v51 = vadd.f32 %v188_v34, %v136_v36  ;;  %v329_v29 = vld [vmem:[%s2994_s3 + $0x1f8] sm:$0xff] }
  0x9c   :  { %888 = vmatpush.msra.mxu0 %v536_v20  ;;  %908 = vmatpush.msra.mxu1 %v568_v50  ;;  %v526_v20 = vld [vmem:[%s2994_s3 + $0x820] sm:$0xff]  ;;  %v524_v58 = vld [vmem:[%s2994_s3 + $0x810] sm:$0xff]  ;;  %v2145_v62 = vadd.f32 %v219_v47, %v201_v31  ;;  %v321_v31 = vld [vmem:[%s2994_s3 + $0x1b8] sm:$0xff] }
  0x9d   :  { %928 = vmatpush.msra.mxu2 %v600_v55  ;;  %948 = vmatpush.msra.mxu3 %v632_v56  ;;  %v558_v50 = vld [vmem:[%s2994_s3 + $0x920] sm:$0xff]  ;;  %v221_v55 = vperm.slane %v2094_v33, 3  ;;  %v556_v59 = vld [vmem:[%s2994_s3 + $0x910] sm:$0xff]  ;;  %v2143_v61 = vadd.f32 %v218_v49, %v200_v48  ;;  %v289_v49 = vld [vmem:[%s2994_s3 + $0xb8] sm:$0xff] }
  0x9e   :  { %889 = vmatpush.msra.mxu0 %v534_v8  ;;  %909 = vmatpush.msra.mxu1 %v566_v60  ;;  %v590_v56 = vld [vmem:[%s2994_s3 + $0xa20] sm:$0xff]  ;;  %v588_v8 = vld [vmem:[%s2994_s3 + $0xa10] sm:$0xff] }
  0x9f   :  { %929 = vmatpush.msra.mxu2 %v598_v4  ;;  %949 = vmatpush.msra.mxu3 %v630_v6  ;;  %v620_v60 = vld [vmem:[%s2994_s3 + $0xb10] sm:$0xff]  ;;  %v554_v4 = vld [vmem:[%s2994_s3 + $0x900] sm:$0xff]  ;;  %v2153_v6 = vadd.f32 %v220_v53, %v202_v51  ;;  %v2155_v19 = vadd.f32 %v221_v55, %v203_v54  ;;  %v319_v51 = vld [vmem:[%s2994_s3 + $0x1a8] sm:$0xff] }
  0xa0   :  { %890 = vmatpush.msra.mxu0 %v532_v35  ;;  %910 = vmatpush.msra.mxu1 %v564_v52  ;;  %v586_v41 = vld [vmem:[%s2994_s3 + $0xa00] sm:$0xff]  ;;  %v260_v35 = vmax.f32 %v2143_v61, 0.0  ;;  %v261_v52 = vmax.f32 %v2145_v62, 0.0  ;;  %v680_v22 = vld [vmem:[%s2994_s3 + $0xcf0] sm:$0xff]  ;;  %v285_v55 = vld [vmem:[%s2994_s3 + $0x98] sm:$0xff] }
  0xa1   :  { %930 = vmatpush.msra.mxu2 %v596_v24  ;;  %950 = vmatpush.msra.mxu3 %v628_v17  ;;  %v262_v16 = vmax.f32 %v2153_v6, 0.0  ;;  %v263_v21 = vmax.f32 %v2155_v19, 0.0  ;;  %v712_v24 = vld [vmem:[%s2994_s3 + $0xdf0] sm:$0xff]  ;;  %v297_v17 = vld [vmem:[%s2994_s3 + $0xf8] sm:$0xff]  ;;  %v678_v30 = vld [vmem:[%s2994_s3 + $0xce0] sm:$0xff] }
  0xa2   :  { %891 = vmatpush.msra.mxu0 %v530_v13  ;;  %911 = vmatpush.msra.mxu1 %v562_v38  ;;  %v710_v34 = vld [vmem:[%s2994_s3 + $0xde0] sm:$0xff]  ;;  %v295_v13 = vld [vmem:[%s2994_s3 + $0xe8] sm:$0xff]  ;;  %v676_v36 = vld [vmem:[%s2994_s3 + $0xcd0] sm:$0xff] }
  0xa3   :  { %931 = vmatpush.msra.mxu2 %v594_v43  ;;  %951 = vmatpush.msra.mxu3 %v626_v44  ;;  %v327_v38 = vld [vmem:[%s2994_s3 + $0x1e8] sm:$0xff]  ;;  %v708_v37 = vld [vmem:[%s2994_s3 + $0xdd0] sm:$0xff]  ;;  %v325_v43 = vld [vmem:[%s2994_s3 + $0x1d8] sm:$0xff] }
  0xa4   :  { %892 = vmatpush.msra.mxu0 %v528_v45  ;;  %912 = vmatpush.msra.mxu1 %v560_v32  ;;  %v674_v44 = vld [vmem:[%s2994_s3 + $0xcc0] sm:$0xff]  ;;  %v291_v32 = vld [vmem:[%s2994_s3 + $0xc8] sm:$0xff]  ;;  %v704_v48 = vld [vmem:[%s2994_s3 + $0xdb0] sm:$0xff] }
  0xa5   :  { %932 = vmatpush.msra.mxu2 %v592_v23  ;;  %952 = vmatpush.msra.mxu3 %v624_v46  ;;  %v706_v45 = vld [vmem:[%s2994_s3 + $0xdc0] sm:$0xff]  ;;  %v323_v23 = vld [vmem:[%s2994_s3 + $0x1c8] sm:$0xff]  ;;  %v672_v46 = vld [vmem:[%s2994_s3 + $0xcb0] sm:$0xff] }
  0xa6   :  { %893 = vmatpush.msra.mxu0 %v526_v20  ;;  %913 = vmatpush.msra.mxu1 %v558_v50  ;;  %v670_v47 = vld [vmem:[%s2994_s3 + $0xca0] sm:$0xff]  ;;  %v287_v50 = vld [vmem:[%s2994_s3 + $0xa8] sm:$0xff]  ;;  %v668_v53 = vld [vmem:[%s2994_s3 + $0xc90] sm:$0xff] }
  0xa7   :  { %933 = vmatpush.msra.mxu2 %v590_v56  ;;  %953 = vmatpush.msra.mxu3 %v622_v57  ;;  %v702_v20 = vld [vmem:[%s2994_s3 + $0xda0] sm:$0xff]  ;;  %v700_v54 = vld [vmem:[%s2994_s3 + $0xd90] sm:$0xff]  ;;  %v317_v56 = vld [vmem:[%s2994_s3 + $0x198] sm:$0xff] }
  0xa8   :  { %894 = vmatpush.msra.mxu0 %v524_v58  ;;  %914 = vmatpush.msra.mxu1 %v556_v59  ;;  %v666_v57 = vld [vmem:[%s2994_s3 + $0xc80] sm:$0xff]  ;;  %v283_v59 = vld [vmem:[%s2994_s3 + $0x88] sm:$0xff]  ;;  %v613_v61 = vld [vmem:[%s2994_s3 + $0xad8] sm:$0xff] }
  0xa9   :  { %934 = vmatpush.msra.mxu2 %v588_v8  ;;  %954 = vmatpush.msra.mxu3 %v620_v60  ;;  %v698_v58 = vld [vmem:[%s2994_s3 + $0xd80] sm:$0xff]  ;;  %v315_v8 = vld [vmem:[%s2994_s3 + $0x188] sm:$0xff]  ;;  %v664_v60 = vld [vmem:[%s2994_s3 + $0xc70] sm:$0xff] }
  0xaa   :  { %895 = vmatpush.msra.mxu0 %v522_v63  ;;  %915 = vmatpush.msra.mxu1 %v554_v4  ;;  %v696_v63 = vld [vmem:[%s2994_s3 + $0xd70] sm:$0xff]  ;;  %v281_v4 = vld [vmem:[%s2994_s3 + $0x78] sm:$0xff]  ;;  %v714_v6 = vld [vmem:[%s2995_s4] sm:$0x3]  ;;  %s1347_s4 = smov [#allocation2]  }
  0xab   :  { %935 = vmatpush.msra.mxu2 %v586_v41  ;;  %955 = vmatpush.msra.mxu3 %v618_v15  ;;  %v313_v41 = vld [vmem:[%s2994_s3 + $0x178] sm:$0xff]  ;;  %v662_v15 = vld [vmem:[%s2994_s3 + $0xc60] sm:$0xff]  ;;  %s1294_s30 = sshll.u32 %s1347_s4, 4  ;;  %s1295_s30 = int_to_ptr.vmem [resolvable:$true] %s1294_s30 }
  0xac   :  { %896 = vmatmul.f32.vlgmr.msra.gmra.mxu0 %v260_v35  ;;  %916 = vmatmul.f32.vlgmr.msra.gmra.mxu1 %v261_v52  ;;  %v645_v62 = vld [vmem:[%s2994_s3 + $0xbd8] sm:$0xff] }
  0xad   :  { %936 = vmatmul.f32.vlgmr.msra.gmra.mxu2 %v262_v16  ;;  %956 = vmatmul.f32.vlgmr.msra.gmra.mxu3 %v263_v21 }
  0xae   :  { %960 = vmatpush.msrb.mxu0 %v680_v22  ;;  %980 = vmatpush.msrb.mxu1 %v712_v24  ;;  %v694_v22 = vld [vmem:[%s2994_s3 + $0xd60] sm:$0xff]  ;;  %v279_v24 = vld [vmem:[%s2994_s3 + $0x68] sm:$0xff] }
  0xaf   :  { %1000 = vmatpush.msrb.mxu2 %v297_v17  ;;  %1020 = vmatpush.msrb.mxu3 %v329_v29  ;;  %v311_v17 = vld [vmem:[%s2994_s3 + $0x168] sm:$0xff]  ;;  %v660_v29 = vld [vmem:[%s2994_s3 + $0xc50] sm:$0xff] }
  0xb0   :  { %961 = vmatpush.msrb.mxu0 %v678_v30  ;;  %981 = vmatpush.msrb.mxu1 %v710_v34  ;;  %v692_v30 = vld [vmem:[%s2994_s3 + $0xd50] sm:$0xff]  ;;  %v277_v34 = vld [vmem:[%s2994_s3 + $0x58] sm:$0xff] }
  0xb1   :  { %1001 = vmatpush.msrb.mxu2 %v295_v13  ;;  %1021 = vmatpush.msrb.mxu3 %v327_v38  ;;  %v309_v13 = vld [vmem:[%s2994_s3 + $0x158] sm:$0xff]  ;;  %v658_v38 = vld [vmem:[%s2994_s3 + $0xc40] sm:$0xff] }
  0xb2   :  { %962 = vmatpush.msrb.mxu0 %v676_v36  ;;  %982 = vmatpush.msrb.mxu1 %v708_v37  ;;  %v690_v36 = vld [vmem:[%s2994_s3 + $0xd40] sm:$0xff]  ;;  %v275_v37 = vld [vmem:[%s2994_s3 + $0x48] sm:$0xff] }
  0xb3   :  { %1002 = vmatpush.msrb.mxu2 %v293_v42  ;;  %1022 = vmatpush.msrb.mxu3 %v325_v43  ;;  %v307_v42 = vld [vmem:[%s2994_s3 + $0x148] sm:$0xff]  ;;  %v656_v43 = vld [vmem:[%s2994_s3 + $0xc30] sm:$0xff] }
  0xb4   :  { %963 = vmatpush.msrb.mxu0 %v674_v44  ;;  %983 = vmatpush.msrb.mxu1 %v706_v45  ;;  %v688_v44 = vld [vmem:[%s2994_s3 + $0xd30] sm:$0xff]  ;;  %v273_v45 = vld [vmem:[%s2994_s3 + $0x38] sm:$0xff] }
  0xb5   :  { %1003 = vmatpush.msrb.mxu2 %v291_v32  ;;  %1023 = vmatpush.msrb.mxu3 %v323_v23  ;;  %v305_v32 = vld [vmem:[%s2994_s3 + $0x138] sm:$0xff]  ;;  %v222_v23 = vperm.slane %v2094_v33, 4 }
  0xb6   :  { %964 = vmatpush.msrb.mxu0 %v672_v46  ;;  %984 = vmatpush.msrb.mxu1 %v704_v48  ;;  %v223_v46 = vperm.slane %v2094_v33, 5  ;;  %v654_v48 = vld [vmem:[%s2994_s3 + $0xc20] sm:$0xff]  ;;  %v303_v33 = vld [vmem:[%s2994_s3 + $0x128] sm:$0xff] }
  0xb7   :  { %1004 = vmatpush.msrb.mxu2 %v289_v49  ;;  %1024 = vmatpush.msrb.mxu3 %v321_v31  ;;  %v686_v49 = vld [vmem:[%s2994_s3 + $0xd20] sm:$0xff]  ;;  %v271_v31 = vld [vmem:[%s2994_s3 + $0x28] sm:$0xff] }
  0xb8   :  { %965 = vmatpush.msrb.mxu0 %v670_v47  ;;  %985 = vmatpush.msrb.mxu1 %v702_v20  ;;  %v652_v47 = vld [vmem:[%s2994_s3 + $0xc10] sm:$0xff] }
  0xb9   :  { %1005 = vmatpush.msrb.mxu2 %v287_v50  ;;  %1025 = vmatpush.msrb.mxu3 %v319_v51  ;;  %v684_v20 = vld [vmem:[%s2994_s3 + $0xd10] sm:$0xff]  ;;  %v269_v50 = vld [vmem:[%s2994_s3 + $0x18] sm:$0xff] }
  0xba   :  { %966 = vmatpush.msrb.mxu0 %v668_v53  ;;  %986 = vmatpush.msrb.mxu1 %v700_v54  ;;  %v301_v51 = vld [vmem:[%s2994_s3 + $0x118] sm:$0xff]  ;;  %v2358_v53 = vadd.f32 %v222_v23, %v1956_v39  ;;  %v2361_v54 = vadd.f32 %v223_v46, %v1958_v9  ;;  %v267_v39 = vld [vmem:[%s2994_s3 + $0x8] sm:$0xff] }
  0xbb   :  { %1006 = vmatpush.msrb.mxu2 %v285_v55  ;;  %1026 = vmatpush.msrb.mxu3 %v317_v56  ;;  %v650_v55 = vld [vmem:[%s2994_s3 + $0xc00] sm:$0xff]  ;;  %v299_v9 = vld [vmem:[%s2994_s3 + $0x108] sm:$0xff]  ;;  %v413_v23 = vld [vmem:[%s2994_s3 + $0x498] sm:$0xff] }
  0xbc   :  { %967 = vmatpush.msrb.mxu0 %v666_v57  ;;  %987 = vmatpush.msrb.mxu1 %v698_v58  ;;  %v682_v56 = vld [vmem:[%s2994_s3 + $0xd00] sm:$0xff]  ;;  %v264_v57 = vmax.f32 %v2358_v53, 0.0  ;;  %v265_v58 = vmax.f32 %v2361_v54, 0.0  ;;  %v445_v46 = vld [vmem:[%s2994_s3 + $0x598] sm:$0xff] }
  0xbd   :  { %1007 = vmatpush.msrb.mxu2 %v283_v59  ;;  %1027 = vmatpush.msrb.mxu3 %v315_v8  ;;  %v361_v59 = vld [vmem:[%s2994_s3 + $0x2f8] sm:$0xff] }
  0xbe   :  { %968 = vmatpush.msrb.mxu0 %v664_v60  ;;  %988 = vmatpush.msrb.mxu1 %v696_v63  ;;  %v393_v8 = vld [vmem:[%s2994_s3 + $0x3f8] sm:$0xff] }
  0xbf   :  { %1008 = vmatpush.msrb.mxu2 %v281_v4  ;;  %1028 = vmatpush.msrb.mxu3 %v313_v41  ;;  %v425_v60 = vld [vmem:[%s2994_s3 + $0x4f8] sm:$0xff]  ;;  %v359_v4 = vld [vmem:[%s2994_s3 + $0x2e8] sm:$0xff] }
  0xc0   :  { %969 = vmatpush.msrb.mxu0 %v662_v15  ;;  %989 = vmatpush.msrb.mxu1 %v694_v22  ;;  %v457_v63 = vld [vmem:[%s2994_s3 + $0x5f8] sm:$0xff]  ;;  %v391_v41 = vld [vmem:[%s2994_s3 + $0x3e8] sm:$0xff] }
  0xc1   :  { %1009 = vmatpush.msrb.mxu2 %v279_v24  ;;  %1029 = vmatpush.msrb.mxu3 %v311_v17  ;;  %v423_v15 = vld [vmem:[%s2994_s3 + $0x4e8] sm:$0xff]  ;;  %v453_v22 = vld [vmem:[%s2994_s3 + $0x5d8] sm:$0xff] }
  0xc2   :  { %970 = vmatpush.msrb.mxu0 %v660_v29  ;;  %990 = vmatpush.msrb.mxu1 %v692_v30  ;;  %v355_v24 = vld [vmem:[%s2994_s3 + $0x2c8] sm:$0xff] }
  0xc3   :  { %1010 = vmatpush.msrb.mxu2 %v277_v34  ;;  %1030 = vmatpush.msrb.mxu3 %v309_v13  ;;  %v387_v17 = vld [vmem:[%s2994_s3 + $0x3c8] sm:$0xff]  ;;  %v353_v34 = vld [vmem:[%s2994_s3 + $0x2b8] sm:$0xff] }
  0xc4   :  { %971 = vmatpush.msrb.mxu0 %v658_v38  ;;  %991 = vmatpush.msrb.mxu1 %v690_v36  ;;  %v419_v29 = vld [vmem:[%s2994_s3 + $0x4c8] sm:$0xff]  ;;  %v385_v13 = vld [vmem:[%s2994_s3 + $0x3b8] sm:$0xff] }
  0xc5   :  { %1011 = vmatpush.msrb.mxu2 %v275_v37  ;;  %1031 = vmatpush.msrb.mxu3 %v307_v42  ;;  %v451_v30 = vld [vmem:[%s2994_s3 + $0x5c8] sm:$0xff]  ;;  %v417_v38 = vld [vmem:[%s2994_s3 + $0x4b8] sm:$0xff] }
  0xc6   :  { %972 = vmatpush.msrb.mxu0 %v656_v43  ;;  %992 = vmatpush.msrb.mxu1 %v688_v44  ;;  %v449_v36 = vld [vmem:[%s2994_s3 + $0x5b8] sm:$0xff]  ;;  %v351_v37 = vld [vmem:[%s2994_s3 + $0x2a8] sm:$0xff] }
  0xc7   :  { %1012 = vmatpush.msrb.mxu2 %v273_v45  ;;  %1032 = vmatpush.msrb.mxu3 %v305_v32  ;;  %v383_v42 = vld [vmem:[%s2994_s3 + $0x3a8] sm:$0xff]  ;;  %v349_v45 = vld [vmem:[%s2994_s3 + $0x298] sm:$0xff] }
  0xc8   :  { %973 = vmatpush.msrb.mxu0 %v654_v48  ;;  %993 = vmatpush.msrb.mxu1 %v686_v49  ;;  %v415_v43 = vld [vmem:[%s2994_s3 + $0x4a8] sm:$0xff]  ;;  %v381_v32 = vld [vmem:[%s2994_s3 + $0x398] sm:$0xff] }
  0xc9   :  { %1013 = vmatpush.msrb.mxu2 %v271_v31  ;;  %1033 = vmatpush.msrb.mxu3 %v303_v33  ;;  %v447_v44 = vld [vmem:[%s2994_s3 + $0x5a8] sm:$0xff] }
  0xca   :  { %974 = vmatpush.msrb.mxu0 %v652_v47  ;;  %994 = vmatpush.msrb.mxu1 %v684_v20  ;;  %v347_v48 = vld [vmem:[%s2994_s3 + $0x288] sm:$0xff]  ;;  %v345_v47 = vld [vmem:[%s2994_s3 + $0x278] sm:$0xff] }
  0xcb   :  { %1014 = vmatpush.msrb.mxu2 %v269_v50  ;;  %1034 = vmatpush.msrb.mxu3 %v301_v51  ;;  %v379_v49 = vld [vmem:[%s2994_s3 + $0x388] sm:$0xff]  ;;  %v377_v20 = vld [vmem:[%s2994_s3 + $0x378] sm:$0xff] }
  0xcc   :  { %975 = vmatpush.msrb.mxu0 %v650_v55  ;;  %995 = vmatpush.msrb.mxu1 %v682_v56  ;;  %v411_v31 = vld [vmem:[%s2994_s3 + $0x488] sm:$0xff]  ;;  %v409_v50 = vld [vmem:[%s2994_s3 + $0x478] sm:$0xff] }
  0xcd   :  { %1015 = vmatpush.msrb.mxu2 %v267_v39  ;;  %1035 = vmatpush.msrb.mxu3 %v299_v9  ;;  %v443_v33 = vld [vmem:[%s2994_s3 + $0x588] sm:$0xff]  ;;  %v441_v51 = vld [vmem:[%s2994_s3 + $0x578] sm:$0xff] }
  0xce   :  { %976 = vmatmul.f32.vlgmr.msrb.gmra.mxu0 %v264_v57  ;;  %996 = vmatmul.f32.vlgmr.msrb.gmra.mxu1 %v265_v58  ;;  %v343_v55 = vld [vmem:[%s2994_s3 + $0x268] sm:$0xff] }
  0xcf   :  { %1016 = vmatmul.f32.vlgmr.msrb.gmra.mxu2 %v252_v40  ;;  %1036 = vmatmul.f32.vlgmr.msrb.gmra.mxu3 %v253_v5  ;;  %v389_v40 = vld [vmem:[%s2994_s3 + $0x3d8] sm:$0xff]  ;;  %v375_v56 = vld [vmem:[%s2994_s3 + $0x368] sm:$0xff] }
  0xd0   :  { %1040 = vmatpush.msra.mxu0 %v361_v59  ;;  %1060 = vmatpush.msra.mxu1 %v393_v8  ;;  %v421_v5 = vld [vmem:[%s2994_s3 + $0x4d8] sm:$0xff]  ;;  %v407_v39 = vld [vmem:[%s2994_s3 + $0x468] sm:$0xff] }
  0xd1   :  { %1080 = vmatpush.msra.mxu2 %v425_v60  ;;  %1100 = vmatpush.msra.mxu3 %v457_v63  ;;  %v439_v9 = vld [vmem:[%s2994_s3 + $0x568] sm:$0xff]  ;;  %v341_v59 = vld [vmem:[%s2994_s3 + $0x258] sm:$0xff] }
  0xd2   :  { %1041 = vmatpush.msra.mxu0 %v359_v4  ;;  %1061 = vmatpush.msra.mxu1 %v391_v41  ;;  %v373_v8 = vld [vmem:[%s2994_s3 + $0x358] sm:$0xff]  ;;  %v339_v4 = vld [vmem:[%s2994_s3 + $0x248] sm:$0xff] }
  0xd3   :  { %1081 = vmatpush.msra.mxu2 %v423_v15  ;;  %1101 = vmatpush.msra.mxu3 %v455_v25  ;;  %v405_v60 = vld [vmem:[%s2994_s3 + $0x458] sm:$0xff]  ;;  %v371_v41 = vld [vmem:[%s2994_s3 + $0x348] sm:$0xff] }
  0xd4   :  { %1042 = vmatpush.msra.mxu0 %v357_v26  ;;  %1062 = vmatpush.msra.mxu1 %v389_v40  ;;  %v437_v63 = vld [vmem:[%s2994_s3 + $0x558] sm:$0xff]  ;;  %v403_v15 = vld [vmem:[%s2994_s3 + $0x448] sm:$0xff] }
  0xd5   :  { %1082 = vmatpush.msra.mxu2 %v421_v5  ;;  %1102 = vmatpush.msra.mxu3 %v453_v22  ;;  %v435_v25 = vld [vmem:[%s2994_s3 + $0x548] sm:$0xff]  ;;  %v337_v26 = vld [vmem:[%s2994_s3 + $0x238] sm:$0xff] }
  0xd6   :  { %1043 = vmatpush.msra.mxu0 %v355_v24  ;;  %1063 = vmatpush.msra.mxu1 %v387_v17  ;;  %v369_v40 = vld [vmem:[%s2994_s3 + $0x338] sm:$0xff]  ;;  %v335_v24 = vld [vmem:[%s2994_s3 + $0x228] sm:$0xff] }
  0xd7   :  { %1083 = vmatpush.msra.mxu2 %v419_v29  ;;  %1103 = vmatpush.msra.mxu3 %v451_v30  ;;  %v401_v5 = vld [vmem:[%s2994_s3 + $0x438] sm:$0xff]  ;;  %v367_v17 = vld [vmem:[%s2994_s3 + $0x328] sm:$0xff] }
  0xd8   :  { %1044 = vmatpush.msra.mxu0 %v353_v34  ;;  %1064 = vmatpush.msra.mxu1 %v385_v13  ;;  %v433_v22 = vld [vmem:[%s2994_s3 + $0x538] sm:$0xff]  ;;  %v399_v29 = vld [vmem:[%s2994_s3 + $0x428] sm:$0xff] }
  0xd9   :  { %1084 = vmatpush.msra.mxu2 %v417_v38  ;;  %1104 = vmatpush.msra.mxu3 %v449_v36  ;;  %v431_v30 = vld [vmem:[%s2994_s3 + $0x528] sm:$0xff]  ;;  %v333_v34 = vld [vmem:[%s2994_s3 + $0x218] sm:$0xff] }
  0xda   :  { %1045 = vmatpush.msra.mxu0 %v351_v37  ;;  %1065 = vmatpush.msra.mxu1 %v383_v42  ;;  %v365_v13 = vld [vmem:[%s2994_s3 + $0x318] sm:$0xff]  ;;  %v331_v37 = vld [vmem:[%s2994_s3 + $0x208] sm:$0xff] }
  0xdb   :  { %1085 = vmatpush.msra.mxu2 %v415_v43  ;;  %1105 = vmatpush.msra.mxu3 %v447_v44  ;;  %v397_v38 = vld [vmem:[%s2994_s3 + $0x418] sm:$0xff]  ;;  %v363_v42 = vld [vmem:[%s2994_s3 + $0x308] sm:$0xff] }
  0xdc   :  { %1046 = vmatpush.msra.mxu0 %v349_v45  ;;  %1066 = vmatpush.msra.mxu1 %v381_v32  ;;  %v429_v36 = vld [vmem:[%s2994_s3 + $0x518] sm:$0xff]  ;;  %v395_v43 = vld [vmem:[%s2994_s3 + $0x408] sm:$0xff] }
  0xdd   :  { %1086 = vmatpush.msra.mxu2 %v413_v23  ;;  %1106 = vmatpush.msra.mxu3 %v445_v46  ;;  %v427_v44 = vld [vmem:[%s2994_s3 + $0x508] sm:$0xff]  ;;  %v489_v45 = vld [vmem:[%s2994_s3 + $0x6f8] sm:$0xff] }
  0xde   :  { %1047 = vmatpush.msra.mxu0 %v347_v48  ;;  %1067 = vmatpush.msra.mxu1 %v379_v49  ;;  %v521_v32 = vld [vmem:[%s2994_s3 + $0x7f8] sm:$0xff]  ;;  %v483_v48 = vld [vmem:[%s2994_s3 + $0x6c8] sm:$0xff] }
  0xdf   :  { %1087 = vmatpush.msra.mxu2 %v411_v31  ;;  %1107 = vmatpush.msra.mxu3 %v443_v33  ;;  %v553_v23 = vld [vmem:[%s2994_s3 + $0x8f8] sm:$0xff]  ;;  %v515_v49 = vld [vmem:[%s2994_s3 + $0x7c8] sm:$0xff] }
  0xe0   :  { %1048 = vmatpush.msra.mxu0 %v345_v47  ;;  %1068 = vmatpush.msra.mxu1 %v377_v20  ;;  %v585_v46 = vld [vmem:[%s2994_s3 + $0x9f8] sm:$0xff]  ;;  %v547_v31 = vld [vmem:[%s2994_s3 + $0x8c8] sm:$0xff] }
  0xe1   :  { %1088 = vmatpush.msra.mxu2 %v409_v50  ;;  %1108 = vmatpush.msra.mxu3 %v441_v51  ;;  %v579_v33 = vld [vmem:[%s2994_s3 + $0x9c8] sm:$0xff]  ;;  %v481_v47 = vld [vmem:[%s2994_s3 + $0x6b8] sm:$0xff] }
  0xe2   :  { %1049 = vmatpush.msra.mxu0 %v343_v55  ;;  %1069 = vmatpush.msra.mxu1 %v375_v56  ;;  %v513_v20 = vld [vmem:[%s2994_s3 + $0x7b8] sm:$0xff]  ;;  %v479_v55 = vld [vmem:[%s2994_s3 + $0x6a8] sm:$0xff] }
  0xe3   :  { %1089 = vmatpush.msra.mxu2 %v407_v39  ;;  %1109 = vmatpush.msra.mxu3 %v439_v9  ;;  %v545_v50 = vld [vmem:[%s2994_s3 + $0x8b8] sm:$0xff]  ;;  %v511_v56 = vld [vmem:[%s2994_s3 + $0x7a8] sm:$0xff] }
  0xe4   :  { %1050 = vmatpush.msra.mxu0 %v341_v59  ;;  %1070 = vmatpush.msra.mxu1 %v373_v8  ;;  %v577_v51 = vld [vmem:[%s2994_s3 + $0x9b8] sm:$0xff]  ;;  %v543_v39 = vld [vmem:[%s2994_s3 + $0x8a8] sm:$0xff] }
  0xe5   :  { %1090 = vmatpush.msra.mxu2 %v405_v60  ;;  %1110 = vmatpush.msra.mxu3 %v437_v63  ;;  %v575_v9 = vld [vmem:[%s2994_s3 + $0x9a8] sm:$0xff]  ;;  %v477_v59 = vld [vmem:[%s2994_s3 + $0x698] sm:$0xff] }
  0xe6   :  { %1051 = vmatpush.msra.mxu0 %v339_v4  ;;  %1071 = vmatpush.msra.mxu1 %v371_v41  ;;  %v509_v8 = vld [vmem:[%s2994_s3 + $0x798] sm:$0xff]  ;;  %v475_v4 = vld [vmem:[%s2994_s3 + $0x688] sm:$0xff] }
  0xe7   :  { %1091 = vmatpush.msra.mxu2 %v403_v15  ;;  %1111 = vmatpush.msra.mxu3 %v435_v25  ;;  %v541_v60 = vld [vmem:[%s2994_s3 + $0x898] sm:$0xff]  ;;  %v507_v41 = vld [vmem:[%s2994_s3 + $0x788] sm:$0xff] }
  0xe8   :  { %1052 = vmatpush.msra.mxu0 %v337_v26  ;;  %1072 = vmatpush.msra.mxu1 %v369_v40  ;;  %v573_v63 = vld [vmem:[%s2994_s3 + $0x998] sm:$0xff]  ;;  %v539_v15 = vld [vmem:[%s2994_s3 + $0x888] sm:$0xff] }
  0xe9   :  { %1092 = vmatpush.msra.mxu2 %v401_v5  ;;  %1112 = vmatpush.msra.mxu3 %v433_v22  ;;  %v571_v25 = vld [vmem:[%s2994_s3 + $0x988] sm:$0xff]  ;;  %v473_v26 = vld [vmem:[%s2994_s3 + $0x678] sm:$0xff] }
  0xea   :  { %1053 = vmatpush.msra.mxu0 %v335_v24  ;;  %1073 = vmatpush.msra.mxu1 %v367_v17  ;;  %v505_v40 = vld [vmem:[%s2994_s3 + $0x778] sm:$0xff]  ;;  %v471_v24 = vld [vmem:[%s2994_s3 + $0x668] sm:$0xff] }
  0xeb   :  { %1093 = vmatpush.msra.mxu2 %v399_v29  ;;  %1113 = vmatpush.msra.mxu3 %v431_v30  ;;  %v537_v5 = vld [vmem:[%s2994_s3 + $0x878] sm:$0xff]  ;;  %v503_v17 = vld [vmem:[%s2994_s3 + $0x768] sm:$0xff] }
  0xec   :  { %1054 = vmatpush.msra.mxu0 %v333_v34  ;;  %1074 = vmatpush.msra.mxu1 %v365_v13  ;;  %v569_v22 = vld [vmem:[%s2994_s3 + $0x978] sm:$0xff]  ;;  %v535_v29 = vld [vmem:[%s2994_s3 + $0x868] sm:$0xff] }
  0xed   :  { %1094 = vmatpush.msra.mxu2 %v397_v38  ;;  %1114 = vmatpush.msra.mxu3 %v429_v36  ;;  %v567_v30 = vld [vmem:[%s2994_s3 + $0x968] sm:$0xff]  ;;  %v469_v34 = vld [vmem:[%s2994_s3 + $0x658] sm:$0xff] }
  0xee   :  { %1055 = vmatpush.msra.mxu0 %v331_v37  ;;  %1075 = vmatpush.msra.mxu1 %v363_v42  ;;  %v501_v13 = vld [vmem:[%s2994_s3 + $0x758] sm:$0xff]  ;;  %v467_v37 = vld [vmem:[%s2994_s3 + $0x648] sm:$0xff] }
  0xef   :  { %1095 = vmatpush.msra.mxu2 %v395_v43  ;;  %1115 = vmatpush.msra.mxu3 %v427_v44  ;;  %v533_v38 = vld [vmem:[%s2994_s3 + $0x858] sm:$0xff]  ;;  %v499_v42 = vld [vmem:[%s2994_s3 + $0x748] sm:$0xff] }
  0xf0   :  { %1056 = vmatmul.f32.vlgmr.msra.gmra.mxu0 %v254_v18  ;;  %1076 = vmatmul.f32.vlgmr.msra.gmra.mxu1 %v255_v3  ;;  %v551_v18 = vld [vmem:[%s2994_s3 + $0x8e8] sm:$0xff]  ;;  %v565_v36 = vld [vmem:[%s2994_s3 + $0x958] sm:$0xff] }
  0xf1   :  { %1096 = vmatmul.f32.vlgmr.msra.gmra.mxu2 %v256_v10  ;;  %1116 = vmatmul.f32.vlgmr.msra.gmra.mxu3 %v257_v11  ;;  %v583_v3 = vld [vmem:[%s2994_s3 + $0x9e8] sm:$0xff]  ;;  %v549_v10 = vld [vmem:[%s2994_s3 + $0x8d8] sm:$0xff] }
  0xf2   :  { %1120 = vmatpush.msrb.mxu0 %v489_v45  ;;  %1140 = vmatpush.msrb.mxu1 %v521_v32  ;;  %v581_v11 = vld [vmem:[%s2994_s3 + $0x9d8] sm:$0xff]  ;;  %v531_v43 = vld [vmem:[%s2994_s3 + $0x848] sm:$0xff] }
  0xf3   :  { %1160 = vmatpush.msrb.mxu2 %v553_v23  ;;  %1180 = vmatpush.msrb.mxu3 %v585_v46  ;;  %v563_v44 = vld [vmem:[%s2994_s3 + $0x948] sm:$0xff]  ;;  %v465_v45 = vld [vmem:[%s2994_s3 + $0x638] sm:$0xff] }
  0xf4   :  { %1121 = vmatpush.msrb.mxu0 %v487_v27  ;;  %1141 = vmatpush.msrb.mxu1 %v519_v28  ;;  %v497_v32 = vld [vmem:[%s2994_s3 + $0x738] sm:$0xff]  ;;  %v463_v27 = vld [vmem:[%s2994_s3 + $0x628] sm:$0xff] }
  0xf5   :  { %1161 = vmatpush.msrb.mxu2 %v551_v18  ;;  %1181 = vmatpush.msrb.mxu3 %v583_v3  ;;  %v529_v23 = vld [vmem:[%s2994_s3 + $0x838] sm:$0xff]  ;;  %v495_v28 = vld [vmem:[%s2994_s3 + $0x728] sm:$0xff] }
  0xf6   :  { %1122 = vmatpush.msrb.mxu0 %v485_v0  ;;  %1142 = vmatpush.msrb.mxu1 %v517_v1  ;;  %v561_v46 = vld [vmem:[%s2994_s3 + $0x938] sm:$0xff]  ;;  %v527_v18 = vld [vmem:[%s2994_s3 + $0x828] sm:$0xff] }
  0xf7   :  { %1162 = vmatpush.msrb.mxu2 %v549_v10  ;;  %1182 = vmatpush.msrb.mxu3 %v581_v11  ;;  %v559_v3 = vld [vmem:[%s2994_s3 + $0x928] sm:$0xff]  ;;  %v461_v0 = vld [vmem:[%s2994_s3 + $0x618] sm:$0xff] }
  0xf8   :  { %1123 = vmatpush.msrb.mxu0 %v483_v48  ;;  %1143 = vmatpush.msrb.mxu1 %v515_v49  ;;  %v493_v1 = vld [vmem:[%s2994_s3 + $0x718] sm:$0xff]  ;;  %v459_v48 = vld [vmem:[%s2994_s3 + $0x608] sm:$0xff] }
  0xf9   :  { %1163 = vmatpush.msrb.mxu2 %v547_v31  ;;  %1183 = vmatpush.msrb.mxu3 %v579_v33  ;;  %v525_v10 = vld [vmem:[%s2994_s3 + $0x818] sm:$0xff]  ;;  %v491_v49 = vld [vmem:[%s2994_s3 + $0x708] sm:$0xff] }
  0xfa   :  { %1124 = vmatpush.msrb.mxu0 %v481_v47  ;;  %1144 = vmatpush.msrb.mxu1 %v513_v20  ;;  %v557_v11 = vld [vmem:[%s2994_s3 + $0x918] sm:$0xff]  ;;  %v523_v31 = vld [vmem:[%s2994_s3 + $0x808] sm:$0xff] }
  0xfb   :  { %1164 = vmatpush.msrb.mxu2 %v545_v50  ;;  %1184 = vmatpush.msrb.mxu3 %v577_v51  ;;  %v555_v33 = vld [vmem:[%s2994_s3 + $0x908] sm:$0xff]  ;;  %v617_v47 = vld [vmem:[%s2994_s3 + $0xaf8] sm:$0xff] }
  0xfc   :  { %1125 = vmatpush.msrb.mxu0 %v479_v55  ;;  %1145 = vmatpush.msrb.mxu1 %v511_v56  ;;  %v649_v20 = vld [vmem:[%s2994_s3 + $0xbf8] sm:$0xff]  ;;  %v611_v55 = vld [vmem:[%s2994_s3 + $0xac8] sm:$0xff] }
  0xfd   :  { %1165 = vmatpush.msrb.mxu2 %v543_v39  ;;  %1185 = vmatpush.msrb.mxu3 %v575_v9  ;;  %v681_v50 = vld [vmem:[%s2994_s3 + $0xcf8] sm:$0xff]  ;;  %v643_v56 = vld [vmem:[%s2994_s3 + $0xbc8] sm:$0xff] }
  0xfe   :  { %1126 = vmatpush.msrb.mxu0 %v477_v59  ;;  %1146 = vmatpush.msrb.mxu1 %v509_v8  ;;  %v713_v51 = vld [vmem:[%s2994_s3 + $0xdf8] sm:$0xff]  ;;  %v675_v39 = vld [vmem:[%s2994_s3 + $0xcc8] sm:$0xff] }
  0xff   :  { %1166 = vmatpush.msrb.mxu2 %v541_v60  ;;  %1186 = vmatpush.msrb.mxu3 %v573_v63  ;;  %v707_v9 = vld [vmem:[%s2994_s3 + $0xdc8] sm:$0xff]  ;;  %v609_v59 = vld [vmem:[%s2994_s3 + $0xab8] sm:$0xff] }
 0x100   :  { %1127 = vmatpush.msrb.mxu0 %v475_v4  ;;  %1147 = vmatpush.msrb.mxu1 %v507_v41  ;;  %v641_v8 = vld [vmem:[%s2994_s3 + $0xbb8] sm:$0xff]  ;;  %v607_v4 = vld [vmem:[%s2994_s3 + $0xaa8] sm:$0xff] }
 0x101   :  { %1167 = vmatpush.msrb.mxu2 %v539_v15  ;;  %1187 = vmatpush.msrb.mxu3 %v571_v25  ;;  %v673_v60 = vld [vmem:[%s2994_s3 + $0xcb8] sm:$0xff]  ;;  %v639_v41 = vld [vmem:[%s2994_s3 + $0xba8] sm:$0xff] }
 0x102   :  { %1128 = vmatpush.msrb.mxu0 %v473_v26  ;;  %1148 = vmatpush.msrb.mxu1 %v505_v40  ;;  %v705_v63 = vld [vmem:[%s2994_s3 + $0xdb8] sm:$0xff]  ;;  %v671_v15 = vld [vmem:[%s2994_s3 + $0xca8] sm:$0xff] }
 0x103   :  { %1168 = vmatpush.msrb.mxu2 %v537_v5  ;;  %1188 = vmatpush.msrb.mxu3 %v569_v22  ;;  %v703_v25 = vld [vmem:[%s2994_s3 + $0xda8] sm:$0xff]  ;;  %v605_v26 = vld [vmem:[%s2994_s3 + $0xa98] sm:$0xff] }
 0x104   :  { %1129 = vmatpush.msrb.mxu0 %v471_v24  ;;  %1149 = vmatpush.msrb.mxu1 %v503_v17  ;;  %v637_v40 = vld [vmem:[%s2994_s3 + $0xb98] sm:$0xff]  ;;  %v603_v24 = vld [vmem:[%s2994_s3 + $0xa88] sm:$0xff] }
 0x105   :  { %1169 = vmatpush.msrb.mxu2 %v535_v29  ;;  %1189 = vmatpush.msrb.mxu3 %v567_v30  ;;  %v669_v5 = vld [vmem:[%s2994_s3 + $0xc98] sm:$0xff]  ;;  %v635_v17 = vld [vmem:[%s2994_s3 + $0xb88] sm:$0xff] }
 0x106   :  { %1130 = vmatpush.msrb.mxu0 %v469_v34  ;;  %1150 = vmatpush.msrb.mxu1 %v501_v13  ;;  %v701_v22 = vld [vmem:[%s2994_s3 + $0xd98] sm:$0xff]  ;;  %v667_v29 = vld [vmem:[%s2994_s3 + $0xc88] sm:$0xff] }
 0x107   :  { %1170 = vmatpush.msrb.mxu2 %v533_v38  ;;  %1190 = vmatpush.msrb.mxu3 %v565_v36  ;;  %v699_v30 = vld [vmem:[%s2994_s3 + $0xd88] sm:$0xff]  ;;  %v601_v34 = vld [vmem:[%s2994_s3 + $0xa78] sm:$0xff] }
 0x108   :  { %1131 = vmatpush.msrb.mxu0 %v467_v37  ;;  %1151 = vmatpush.msrb.mxu1 %v499_v42  ;;  %v633_v13 = vld [vmem:[%s2994_s3 + $0xb78] sm:$0xff]  ;;  %v599_v37 = vld [vmem:[%s2994_s3 + $0xa68] sm:$0xff] }
 0x109   :  { %1171 = vmatpush.msrb.mxu2 %v531_v43  ;;  %1191 = vmatpush.msrb.mxu3 %v563_v44  ;;  %v665_v38 = vld [vmem:[%s2994_s3 + $0xc78] sm:$0xff]  ;;  %v631_v42 = vld [vmem:[%s2994_s3 + $0xb68] sm:$0xff] }
 0x10a   :  { %1132 = vmatpush.msrb.mxu0 %v465_v45  ;;  %1152 = vmatpush.msrb.mxu1 %v497_v32  ;;  %v697_v36 = vld [vmem:[%s2994_s3 + $0xd78] sm:$0xff]  ;;  %v663_v43 = vld [vmem:[%s2994_s3 + $0xc68] sm:$0xff] }
 0x10b   :  { %1172 = vmatpush.msrb.mxu2 %v529_v23  ;;  %1192 = vmatpush.msrb.mxu3 %v561_v46  ;;  %v695_v44 = vld [vmem:[%s2994_s3 + $0xd68] sm:$0xff]  ;;  %v597_v45 = vld [vmem:[%s2994_s3 + $0xa58] sm:$0xff] }
 0x10c   :  { %1133 = vmatpush.msrb.mxu0 %v463_v27  ;;  %1153 = vmatpush.msrb.mxu1 %v495_v28  ;;  %v629_v32 = vld [vmem:[%s2994_s3 + $0xb58] sm:$0xff]  ;;  %v595_v27 = vld [vmem:[%s2994_s3 + $0xa48] sm:$0xff] }
 0x10d   :  { %1173 = vmatpush.msrb.mxu2 %v527_v18  ;;  %1193 = vmatpush.msrb.mxu3 %v559_v3  ;;  %v661_v23 = vld [vmem:[%s2994_s3 + $0xc58] sm:$0xff]  ;;  %v627_v28 = vld [vmem:[%s2994_s3 + $0xb48] sm:$0xff] }
 0x10e   :  { %1134 = vmatpush.msrb.mxu0 %v461_v0  ;;  %1154 = vmatpush.msrb.mxu1 %v493_v1  ;;  %v693_v46 = vld [vmem:[%s2994_s3 + $0xd58] sm:$0xff]  ;;  %v659_v18 = vld [vmem:[%s2994_s3 + $0xc48] sm:$0xff] }
 0x10f   :  { %1174 = vmatpush.msrb.mxu2 %v525_v10  ;;  %1194 = vmatpush.msrb.mxu3 %v557_v11  ;;  %v691_v3 = vld [vmem:[%s2994_s3 + $0xd48] sm:$0xff]  ;;  %v593_v0 = vld [vmem:[%s2994_s3 + $0xa38] sm:$0xff] }
 0x110   :  { %1135 = vmatpush.msrb.mxu0 %v459_v48  ;;  %1155 = vmatpush.msrb.mxu1 %v491_v49  ;;  %v625_v1 = vld [vmem:[%s2994_s3 + $0xb38] sm:$0xff]  ;;  %v591_v48 = vld [vmem:[%s2994_s3 + $0xa28] sm:$0xff] }
 0x111   :  { %1175 = vmatpush.msrb.mxu2 %v523_v31  ;;  %1195 = vmatpush.msrb.mxu3 %v555_v33  ;;  %v657_v10 = vld [vmem:[%s2994_s3 + $0xc38] sm:$0xff]  ;;  %v623_v49 = vld [vmem:[%s2994_s3 + $0xb28] sm:$0xff] }
 0x112   :  { %1136 = vmatmul.f32.vlgmr.msrb.gmra.mxu0 %v258_v12  ;;  %1156 = vmatmul.f32.vlgmr.msrb.gmra.mxu1 %v259_v14  ;;  %v679_v12 = vld [vmem:[%s2994_s3 + $0xce8] sm:$0xff]  ;;  %v689_v11 = vld [vmem:[%s2994_s3 + $0xd38] sm:$0xff] }
 0x113   :  { %1176 = vmatmul.f32.vlgmr.msrb.gmra.mxu2 %v260_v35  ;;  %1196 = vmatmul.f32.vlgmr.msrb.gmra.mxu3 %v261_v52  ;;  %v711_v14 = vld [vmem:[%s2994_s3 + $0xde8] sm:$0xff]  ;;  %v677_v35 = vld [vmem:[%s2994_s3 + $0xcd8] sm:$0xff] }
 0x114   :  { %1200 = vmatpush.msra.mxu0 %v617_v47  ;;  %1220 = vmatpush.msra.mxu1 %v649_v20  ;;  %v709_v52 = vld [vmem:[%s2994_s3 + $0xdd8] sm:$0xff]  ;;  %v655_v31 = vld [vmem:[%s2994_s3 + $0xc28] sm:$0xff] }
 0x115   :  { %1240 = vmatpush.msra.mxu2 %v681_v50  ;;  %1260 = vmatpush.msra.mxu3 %v713_v51  ;;  %v687_v33 = vld [vmem:[%s2994_s3 + $0xd28] sm:$0xff]  ;;  %v589_v47 = vld [vmem:[%s2994_s3 + $0xa18] sm:$0xff] }
 0x116   :  { %1201 = vmatpush.msra.mxu0 %v615_v2  ;;  %1221 = vmatpush.msra.mxu1 %v647_v7  ;;  %v621_v20 = vld [vmem:[%s2994_s3 + $0xb18] sm:$0xff]  ;;  %v587_v2 = vld [vmem:[%s2994_s3 + $0xa08] sm:$0xff] }
 0x117   :  { %1241 = vmatpush.msra.mxu2 %v679_v12  ;;  %1261 = vmatpush.msra.mxu3 %v711_v14  ;;  %v653_v50 = vld [vmem:[%s2994_s3 + $0xc18] sm:$0xff]  ;;  %v619_v7 = vld [vmem:[%s2994_s3 + $0xb08] sm:$0xff] }
 0x118   :  { %1202 = vmatpush.msra.mxu0 %v613_v61  ;;  %1222 = vmatpush.msra.mxu1 %v645_v62  ;;  %v685_v51 = vld [vmem:[%s2994_s3 + $0xd18] sm:$0xff]  ;;  %v651_v12 = vld [vmem:[%s2994_s3 + $0xc08] sm:$0xff]  ;;  %v737_v61 = vpop.f32.mrf.mxu0  ;;  %v777_v62 = vpop.f32.mrf.mxu2 }
 0x119   :  { %1242 = vmatpush.msra.mxu2 %v677_v35  ;;  %1262 = vmatpush.msra.mxu3 %v709_v52  ;;  %v683_v14 = vld [vmem:[%s2994_s3 + $0xd08] sm:$0xff]  ;;  %v757_v35 = vpop.f32.mrf.mxu1  ;;  %v797_v52 = vpop.f32.mrf.mxu3 }
 0x11a   :  { %1203 = vmatpush.msra.mxu0 %v611_v55  ;;  %1223 = vmatpush.msra.mxu1 %v643_v56 }
 0x11b   :  { %1243 = vmatpush.msra.mxu2 %v675_v39  ;;  %1263 = vmatpush.msra.mxu3 %v707_v9 }
 0x11c   :  { %1204 = vmatpush.msra.mxu0 %v609_v59  ;;  %1224 = vmatpush.msra.mxu1 %v641_v8 }
 0x11d   :  { %1244 = vmatpush.msra.mxu2 %v673_v60  ;;  %1264 = vmatpush.msra.mxu3 %v705_v63 }
 0x11e   :  { %1205 = vmatpush.msra.mxu0 %v607_v4  ;;  %1225 = vmatpush.msra.mxu1 %v639_v41 }
 0x11f   :  { %1245 = vmatpush.msra.mxu2 %v671_v15  ;;  %1265 = vmatpush.msra.mxu3 %v703_v25 }
 0x120   :  { %1206 = vmatpush.msra.mxu0 %v605_v26  ;;  %1226 = vmatpush.msra.mxu1 %v637_v40  ;;  %v817_v55 = vpop.f32.mrf.mxu0  ;;  %v857_v56 = vpop.f32.mrf.mxu2 }
 0x121   :  { %1246 = vmatpush.msra.mxu2 %v669_v5  ;;  %1266 = vmatpush.msra.mxu3 %v701_v22  ;;  %v837_v39 = vpop.f32.mrf.mxu1  ;;  %v877_v9 = vpop.f32.mrf.mxu3 }
 0x122   :  { %1207 = vmatpush.msra.mxu0 %v603_v24  ;;  %1227 = vmatpush.msra.mxu1 %v635_v17 }
 0x123   :  { %1247 = vmatpush.msra.mxu2 %v667_v29  ;;  %1267 = vmatpush.msra.mxu3 %v699_v30 }
 0x124   :  { %1208 = vmatpush.msra.mxu0 %v601_v34  ;;  %1228 = vmatpush.msra.mxu1 %v633_v13 }
 0x125   :  { %1248 = vmatpush.msra.mxu2 %v665_v38  ;;  %1268 = vmatpush.msra.mxu3 %v697_v36 }
 0x126   :  { %1209 = vmatpush.msra.mxu0 %v599_v37  ;;  %1229 = vmatpush.msra.mxu1 %v631_v42 }
 0x127   :  { %1249 = vmatpush.msra.mxu2 %v663_v43  ;;  %1269 = vmatpush.msra.mxu3 %v695_v44 }
 0x128   :  { %1210 = vmatpush.msra.mxu0 %v597_v45  ;;  %1230 = vmatpush.msra.mxu1 %v629_v32 }
 0x129   :  { %1250 = vmatpush.msra.mxu2 %v661_v23  ;;  %1270 = vmatpush.msra.mxu3 %v693_v46  ;;  %v897_v59 = vpop.f32.mrf.mxu0 }
 0x12a   :  { %1211 = vmatpush.msra.mxu0 %v595_v27  ;;  %1231 = vmatpush.msra.mxu1 %v627_v28 }
 0x12b   :  { %1251 = vmatpush.msra.mxu2 %v659_v18  ;;  %1271 = vmatpush.msra.mxu3 %v691_v3 }
 0x12c   :  { %1212 = vmatpush.msra.mxu0 %v593_v0  ;;  %1232 = vmatpush.msra.mxu1 %v625_v1 }
 0x12d   :  { %1252 = vmatpush.msra.mxu2 %v657_v10  ;;  %1272 = vmatpush.msra.mxu3 %v689_v11 }
 0x12e   :  { %1213 = vmatpush.msra.mxu0 %v591_v48  ;;  %1233 = vmatpush.msra.mxu1 %v623_v49 }
 0x12f   :  { %1253 = vmatpush.msra.mxu2 %v655_v31  ;;  %1273 = vmatpush.msra.mxu3 %v687_v33 }
 0x130   :  { %1214 = vmatpush.msra.mxu0 %v589_v47  ;;  %1234 = vmatpush.msra.mxu1 %v621_v20  ;;  %v937_v19 = vpop.f32.mrf.mxu2  ;;  %v957_v53 = vpop.f32.mrf.mxu3 }
 0x131   :  { %1254 = vmatpush.msra.mxu2 %v653_v50  ;;  %1274 = vmatpush.msra.mxu3 %v685_v51 }
 0x132   :  { %1215 = vmatpush.msra.mxu0 %v587_v2  ;;  %1235 = vmatpush.msra.mxu1 %v619_v7 }
 0x133   :  { %1255 = vmatpush.msra.mxu2 %v651_v12  ;;  %1275 = vmatpush.msra.mxu3 %v683_v14 }
 0x134   :  { %1216 = vmatmul.f32.vlgmr.msra.gmra.mxu0 %v262_v16  ;;  %1236 = vmatmul.f32.vlgmr.msra.gmra.mxu1 %v263_v21  ;;  %v716_v16 = vperm.slane %v714_v6, 0  ;;  %v917_v21 = vpop.f32.mrf.mxu1 }
 0x135   :  { %1256 = vmatmul.f32.vlgmr.msra.gmra.mxu2 %v264_v57  ;;  %1276 = vmatmul.f32.vlgmr.msra.gmra.mxu3 %v265_v58  ;;  %v717_v58 = vperm.slane %v714_v6, 1 }
 0x136   :  { %v738_v54 = vadd.f32 %v737_v61, %v716_v16 }
 0x138   :  { %v758_v60 = vadd.f32 %v757_v35, %v738_v54 }
 0x13a   :  { %v778_v41 = vadd.f32 %v777_v62, %v758_v60 }
 0x13c   :  { %v798_v40 = vadd.f32 %v797_v52, %v778_v41 }
 0x13e   :  { %v818_v17 = vadd.f32 %v817_v55, %v798_v40 }
 0x140   :  { %v838_v34 = vadd.f32 %v837_v39, %v818_v17 }
 0x142   :  { %v858_v37 = vadd.f32 %v857_v56, %v838_v34 }
 0x144   :  { %v878_v45 = vadd.f32 %v877_v9, %v858_v37 }
 0x146   :  { %v898_v23 = vadd.f32 %v897_v59, %v878_v45 }
 0x148   :  { %v918_v28 = vadd.f32 %v917_v21, %v898_v23 }
 0x14a   :  { %v938_v0 = vadd.f32 %v937_v19, %v918_v28 }
 0x14b   :  { %v977_v57 = vpop.f32.mrf.mxu0  ;;  %v997_v4 = vpop.f32.mrf.mxu1 }
 0x14c   :  { %v958_v11 = vadd.f32 %v957_v53, %v938_v0 }
 0x14e   :  { %v978_v31 = vadd.f32 %v977_v57, %v958_v11 }
 0x150   :  { %v998_v50 = vadd.f32 %v997_v4, %v978_v31 }
 0x152   :  { %v1017_v8 = vpop.f32.mrf.mxu2  ;;  %v1037_v15 = vpop.f32.mrf.mxu3 }
 0x153   :  { %v1018_v63 = vadd.f32 %v1017_v8, %v717_v58 }
 0x155   :  { %v1038_v26 = vadd.f32 %v1037_v15, %v1018_v63 }
 0x16d   :  { %v1057_v25 = vpop.f32.mrf.mxu0  ;;  %v1077_v22 = vpop.f32.mrf.mxu1 }
 0x16e   :  { %v1058_v5 = vadd.f32 %v1057_v25, %v1038_v26 }
 0x170   :  { %v1078_v29 = vadd.f32 %v1077_v22, %v1058_v5 }
 0x174   :  { %v1097_v24 = vpop.f32.mrf.mxu2  ;;  %v1117_v13 = vpop.f32.mrf.mxu3 }
 0x175   :  { %v1098_v30 = vadd.f32 %v1097_v24, %v1078_v29 }
 0x177   :  { %v1118_v36 = vadd.f32 %v1117_v13, %v1098_v30 }
 0x18f   :  { %v1137_v38 = vpop.f32.mrf.mxu0  ;;  %v1157_v43 = vpop.f32.mrf.mxu1 }
 0x190   :  { %v1138_v42 = vadd.f32 %v1137_v38, %v1118_v36 }
 0x192   :  { %v1158_v32 = vadd.f32 %v1157_v43, %v1138_v42 }
 0x196   :  { %v1177_v44 = vpop.f32.mrf.mxu2  ;;  %v1197_v27 = vpop.f32.mrf.mxu3 }
 0x197   :  { %v1178_v46 = vadd.f32 %v1177_v44, %v1158_v32 }
 0x199   :  { %v1198_v18 = vadd.f32 %v1197_v27, %v1178_v46 }
 0x1b1   :  { %v1217_v3 = vpop.f32.mrf.mxu0  ;;  %v1237_v10 = vpop.f32.mrf.mxu1 }
 0x1b2   :  { %v1218_v1 = vadd.f32 %v1217_v3, %v1198_v18 }
 0x1b4   :  { %v1238_v48 = vadd.f32 %v1237_v10, %v1218_v1 }
 0x1b8   :  { %v1257_v49 = vpop.f32.mrf.mxu2  ;;  %v1277_v47 = vpop.f32.mrf.mxu3 }
 0x1b9   :  { %v1258_v33 = vadd.f32 %v1257_v49, %v1238_v48 }
 0x1bb   :  { %v1278_v20 = vadd.f32 %v1277_v47, %v1258_v33 }
 0x1bd   :  { %v1282_v51 = vrot.slane %v1278_v20, 6 }
 0x1bf   :  { %v1284_v2 = vsel %vm1283_vm0, %v998_v50, %v1282_v51 }
 0x1c0   :  { %1288 = vst.msk [vmem:[#allocation2] sm:$0xf] %vm1287_vm2, %v1284_v2 }
 0x1c1   :  { %1299 = dma.vmem_to_hbm [thread:$0]  %s1295_s30, 64, %s1297_s8, [#allocation3]  }
 0x1c2   :  { %1342 = dma.done.wait [#allocation3], 64  }
 0x1c3   :  { %1343 = vsyncadd [#allocation3], 4294967232 }
 0x1c4   :  { %1304 = vsyncpa [#allocation3], 1 }

</bundles_post_ra>
